<compile_context>
chip_gen: v6e
topology: v6e:2x2x1
jax: 0.10.0
libtpu: 0.0.40
codegen_flags: <defaults>
</compile_context>

<pallas_src>
import functools

import jax
import jax.numpy as jnp
from jax.experimental import pallas as pl
from jax.experimental.pallas import tpu as pltpu

EPS = 1e-3  # set by LinearClassifierCNN.initilize()


# ----------------------------- small-batch path ------------------------------
def _bn_relu(h, gamma, beta):
    # Training-mode BatchNorm1d (biased variance over the batch) + ReLU, in f32.
    mu = jnp.mean(h, axis=0, keepdims=True)
    var = jnp.mean(jnp.square(h - mu), axis=0, keepdims=True)
    return jnp.maximum((h - mu) * jax.lax.rsqrt(var + EPS) * gamma + beta, 0.0)


def _fused_kernel(x_ref, w1_ref, g1_ref, be1_ref, w2_ref, g2_ref, be2_ref,
                  w3_ref, b3_ref, o_ref, acc_ref):
    k = pl.program_id(0)  # fc1 K-chunk

    @pl.when(k == 0)
    def _():
        acc_ref[...] = jnp.zeros_like(acc_ref)

    # fc1, K-tiled.  x arrives f32 (single HBM pass); the bf16 cast is free VPU
    # filler under the MXU-bound dot.
    acc_ref[...] += jnp.dot(x_ref[...].astype(jnp.bfloat16), w1_ref[...],
                            preferred_element_type=jnp.float32)       # [B, 1024]

    @pl.when(k == pl.num_programs(0) - 1)
    def _():
        h = _bn_relu(acc_ref[...], g1_ref[...], be1_ref[...])
        h = jnp.dot(h.astype(jnp.bfloat16), w2_ref[...],
                    preferred_element_type=jnp.float32)                # [B, 256]
        h = _bn_relu(h, g2_ref[...], be2_ref[...])
        out = jnp.dot(h.astype(jnp.bfloat16), w3_ref[...],
                      preferred_element_type=jnp.float32)              # [B, n_pad]
        o_ref[...] = (out + b3_ref[...]).astype(o_ref.dtype)


def _forward_small(x, packed, *, tk=512):
    (w1, g1, be1, w2, g2, be2, w3, b3, n_pad) = packed
    B = x.shape[0]
    nk = 2048 // tk
    const = lambda k: (0, 0)
    grid_spec = pltpu.PrefetchScalarGridSpec(
        num_scalar_prefetch=0,
        grid=(nk,),
        in_specs=[
            pl.BlockSpec((B, tk), lambda k: (0, k)),       # x streamed over K
            pl.BlockSpec((tk, 1024), lambda k: (k, 0)),    # w1 streamed over K
            pl.BlockSpec((1, 1024), const),
            pl.BlockSpec((1, 1024), const),
            pl.BlockSpec((1024, 256), const),
            pl.BlockSpec((1, 256), const),
            pl.BlockSpec((1, 256), const),
            pl.BlockSpec((256, n_pad), const),
            pl.BlockSpec((1, n_pad), const),
        ],
        out_specs=pl.BlockSpec((B, n_pad), const),          # written on last step
        scratch_shapes=[pltpu.VMEM((B, 1024), jnp.float32)],
    )
    return pl.pallas_call(
        _fused_kernel,
        out_shape=jax.ShapeDtypeStruct((B, n_pad), jnp.float32),
        grid_spec=grid_spec,
        compiler_params=pltpu.CompilerParams(
            dimension_semantics=("arbitrary",),
            vmem_limit_bytes=32 << 20),
    )(x, w1, g1, be1, w2, g2, be2, w3, b3)


# ----------------------------- batch-tiled path -------------------------------
def _tiled_kernel(x_ref, w1_ref, g1_ref, be1_ref, w2_ref, g2_ref, be2_ref,
                  w3_ref, b3_ref, o_ref, h1_ref, h2_ref, s1_ref, s2_ref,
                  *, batch, b_pad, tm, n_tiles):
    k = pl.program_id(0)          # phase: 0=fc1, 1=bn1+relu+fc2, 2=bn2+relu+fc3
    i = pl.program_id(1)          # batch tile
    row0 = pl.multiple_of(i * tm, tm)
    inv_b = jnp.float32(1.0 / batch)

    def acc_unmasked(s_ref, h):
        s_ref[0:1, :] += jnp.sum(h, axis=0, keepdims=True)
        s_ref[1:2, :] += jnp.sum(h * h, axis=0, keepdims=True)

    def acc_stats(s_ref, h):
        # Per-feature sum / sum-of-squares over the REAL batch rows only.
        # The padded-row mask (and its iota) only runs on the last tile.
        if b_pad != batch:
            @pl.when(i == n_tiles - 1)
            def _():
                rows = row0 + jax.lax.broadcasted_iota(jnp.int32, (tm, 1), 0)
                acc_unmasked(s_ref, jnp.where(rows < batch, h, 0.0))

            @pl.when(i != n_tiles - 1)
            def _():
                acc_unmasked(s_ref, h)
        else:
            acc_unmasked(s_ref, h)

    def finalize_stats(s_ref, g_ref, be_ref):
        # Turn (sum, sumsq) into folded (scale, shift) for y = h*scale + shift.
        mu = s_ref[0:1, :] * inv_b
        var = s_ref[1:2, :] * inv_b - mu * mu
        scale = g_ref[...] * jax.lax.rsqrt(var + jnp.float32(EPS))
        s_ref[0:1, :] = scale
        s_ref[1:2, :] = be_ref[...] - mu * scale

    @pl.when(k == 0)
    def _phase0():
        @pl.when(i == 0)
        def _():
            s1_ref[...] = jnp.zeros_like(s1_ref)
            s2_ref[...] = jnp.zeros_like(s2_ref)
        h1 = jnp.dot(x_ref[...].astype(jnp.bfloat16), w1_ref[...],
                     preferred_element_type=jnp.float32)              # [tm, 1024]
        acc_stats(s1_ref, h1)                       # stats from the f32 result
        h1_ref[pl.ds(row0, tm), :] = h1.astype(h1_ref.dtype)          # bf16 store

    @pl.when(k == 1)
    def _phase1():
        @pl.when(i == 0)
        def _():
            finalize_stats(s1_ref, g1_ref, be1_ref)
        h = h1_ref[pl.ds(row0, tm), :].astype(jnp.float32)
        h = jnp.maximum(h * s1_ref[0:1, :] + s1_ref[1:2, :], 0.0)
        h2 = jnp.dot(h.astype(jnp.bfloat16), w2_ref[...],
                     preferred_element_type=jnp.float32)              # [tm, 256]
        acc_stats(s2_ref, h2)
        h2_ref[pl.ds(row0, tm), :] = h2.astype(h2_ref.dtype)          # bf16 store

    @pl.when(k == 2)
    def _phase2():
        @pl.when(i == 0)
        def _():
            finalize_stats(s2_ref, g2_ref, be2_ref)
        h = h2_ref[pl.ds(row0, tm), :].astype(jnp.float32)
        h = jnp.maximum(h * s2_ref[0:1, :] + s2_ref[1:2, :], 0.0)
        out = jnp.dot(h.astype(jnp.bfloat16), w3_ref[...],
                      preferred_element_type=jnp.float32)             # [tm, n_pad]
        o_ref[...] = (out + b3_ref[...]).astype(o_ref.dtype)


def _forward_tiled_impl(x, packed, tm, *, single_buffer_resident):
    (w1, g1, be1, w2, g2, be2, w3, b3, n_pad) = packed
    B = x.shape[0]
    n_tiles = pl.cdiv(B, tm)
    b_pad = n_tiles * tm
    if b_pad != B:
        x = jnp.pad(x, ((0, b_pad - B), (0, 0)))

    const = lambda k, i: (0, 0)

    def resident(shape):
        # Resident operands are DMA'd once (constant index_map); a second
        # pipeline buffer is pure VMEM waste, so request single buffering.
        if single_buffer_resident:
            return pl.BlockSpec(shape, const, pipeline_mode=pl.Buffered(1))
        return pl.BlockSpec(shape, const)

    # VMEM budget (bytes).
    w_bytes = (2048 * 1024 + 1024 * 256 + 256 * n_pad) * 2            # bf16 weights
    vec_bytes = (2 * 1024 + 2 * 256 + 2 * n_pad) * 4
    res_mult = 1 if single_buffer_resident else 2
    tile_bytes = 2 * (tm * 2048 * 4 + tm * n_pad * 4)                 # x f32 + out f32, dbl-buffered
    scratch_bytes = (b_pad * 1024 + b_pad * 256) * 2 + (8 * 1024 + 8 * 256) * 4
    vmem_limit = min(int(res_mult * (w_bytes + vec_bytes) + tile_bytes
                         + scratch_bytes + (8 << 20)), 112 << 20)

    kernel = functools.partial(_tiled_kernel, batch=B, b_pad=b_pad, tm=tm,
                               n_tiles=n_tiles)

    grid_spec = pltpu.PrefetchScalarGridSpec(
        num_scalar_prefetch=0,
        grid=(3, n_tiles),
        in_specs=[
            # x is only needed in phase 0; park it on block 0 afterwards.
            pl.BlockSpec((tm, 2048), lambda k, i: (jnp.where(k == 0, i, 0), 0)),
            resident((2048, 1024)),
            resident((1, 1024)),
            resident((1, 1024)),
            resident((1024, 256)),
            resident((1, 256)),
            resident((1, 256)),
            resident((256, n_pad)),
            resident((1, n_pad)),
        ],
        # Output blocks are only written (and hence only flushed) in phase 2.
        out_specs=pl.BlockSpec((tm, n_pad),
                               lambda k, i: (jnp.where(k == 2, i, 0), 0)),
        scratch_shapes=[
            pltpu.VMEM((b_pad, 1024), jnp.bfloat16),  # h1 (full batch, bf16)
            pltpu.VMEM((b_pad, 256), jnp.bfloat16),   # h2 (full batch, bf16)
            pltpu.VMEM((2, 1024), jnp.float32),       # bn1 sum/sumsq -> scale/shift
            pltpu.VMEM((2, 256), jnp.float32),        # bn2 sum/sumsq -> scale/shift
        ],
    )
    return pl.pallas_call(
        kernel,
        out_shape=jax.ShapeDtypeStruct((b_pad, n_pad), jnp.float32),
        grid_spec=grid_spec,
        compiler_params=pltpu.CompilerParams(
            # Phases are sequentially dependent and BN statistics span the full
            # batch (in-place s_ref accumulation), so both axes stay
            # "arbitrary" (single-core sequential).  See megacore TODO above.
            dimension_semantics=("arbitrary", "arbitrary"),
            vmem_limit_bytes=vmem_limit),
    )(x, w1, g1, be1, w2, g2, be2, w3, b3)


def _forward_tiled(x, packed, tm):
    try:
        return _forward_tiled_impl(x, packed, tm, single_buffer_resident=True)
    except Exception:
        # pl.Buffered(1) not supported by this jax/libtpu -> default buffering.
        return _forward_tiled_impl(x, packed, tm, single_buffer_resident=False)


# --------------------------------- wrapper ------------------------------------
def pack_params(params, n_label):
    """PyTorch-layout f32 params -> kernel-ready (bf16, transposed, lane-padded).

    Call once (e.g. via make_linear_classifier_cnn), not per forward."""
    (w1, b1, g1, be1, w2, b2, g2, be2, w3, b3) = params
    del b1, b2  # cancelled exactly by training-mode BatchNorm mean subtraction
    n_pad = ((n_label + 127) // 128) * 128
    w1t = w1.T.astype(jnp.bfloat16)                                    # (2048, 1024)
    w2t = w2.T.astype(jnp.bfloat16)                                    # (1024, 256)
    w3t = jnp.pad(w3.T, ((0, 0), (0, n_pad - n_label))).astype(jnp.bfloat16)
    b3p = jnp.pad(b3, (0, n_pad - n_label)).reshape(1, n_pad).astype(jnp.float32)
    r = lambda v: v.reshape(1, -1).astype(jnp.float32)
    return (w1t, r(g1), r(be1), w2t, r(g2), r(be2), w3t, b3p, n_pad)


def make_linear_classifier_cnn(params, n_label, *, batch_tile=512,
                               small_batch_max=256):
    """Pack params once and return forward(x): [B,2048] f32 -> [B,n_label] f32."""
    packed = pack_params(params, n_label)

    def forward(x):
        B = x.shape[0]
        if B <= small_batch_max:
            out = _forward_small(x, packed)
        else:
            out = _forward_tiled(x, packed, batch_tile)
        return out[:B, :n_label]

    return forward


def linear_classifier_cnn(x, params, n_label, **kwargs):
    """Convenience one-shot wrapper (re-packs params every call)."""
    return make_linear_classifier_cnn(params, n_label, **kwargs)(x)


# ----------------------------- init & references ------------------------------
def init_params(key, n_label=60):
    """Matches LinearClassifierCNN.initilize(): W ~ N(0, 0.01), biases 0,
    BN gamma=1, beta=0.  PyTorch layout: weight is (out, in)."""
    k1, k2, k3 = jax.random.split(key, 3)
    w1 = 0.01 * jax.random.normal(k1, (1024, 2048), jnp.float32)
    w2 = 0.01 * jax.random.normal(k2, (256, 1024), jnp.float32)
    w3 = 0.01 * jax.random.normal(k3, (n_label, 256), jnp.float32)
    b1 = jnp.zeros((1024,), jnp.float32)
    b2 = jnp.zeros((256,), jnp.float32)
    b3 = jnp.zeros((n_label,), jnp.float32)
    g1, be1 = jnp.ones((1024,), jnp.float32), jnp.zeros((1024,), jnp.float32)
    g2, be2 = jnp.ones((256,), jnp.float32), jnp.zeros((256,), jnp.float32)
    return (w1, b1, g1, be1, w2, b2, g2, be2, w3, b3)


def reference_f32(x, params):
    """Exact PyTorch forward semantics (f32, training-mode BN)."""
    (w1, b1, g1, be1, w2, b2, g2, be2, w3, b3) = params

    def bn_relu(h, g, b):
        mu = jnp.mean(h, axis=0, keepdims=True)
        var = jnp.mean((h - mu) ** 2, axis=0, keepdims=True)
        return jnp.maximum((h - mu) / jnp.sqrt(var + EPS) * g + b, 0.0)

    h = bn_relu(x @ w1.T + b1, g1, be1)
    h = bn_relu(h @ w2.T + b2, g2, be2)
    return h @ w3.T + b3


def reference_bf16(x, params, *, bf16_hidden=False):
    """Reference mirroring the kernel's quantization (bf16 matmul inputs, f32
    accumulation/BN; optionally bf16-rounded hidden activations as in the
    batch-tiled kernel's bf16 VMEM scratch)."""
    (w1, _b1, g1, be1, w2, _b2, g2, be2, w3, b3) = params

    def mm(a, w):
        return jnp.dot(a.astype(jnp.bfloat16), w.T.astype(jnp.bfloat16),
                       preferred_element_type=jnp.float32)

    def bn_relu(h, g, b):
        mu = jnp.mean(h, axis=0, keepdims=True)
        var = jnp.mean((h - mu) ** 2, axis=0, keepdims=True)
        if bf16_hidden:
            h = h.astype(jnp.bfloat16).astype(jnp.float32)
        return jnp.maximum((h - mu) * jax.lax.rsqrt(var + EPS) * g + b, 0.0)

    h = bn_relu(mm(x, w1), g1, be1)
    h = bn_relu(mm(h, w2), g2, be2)
    return mm(h, w3) + b3


# ----------------------------------- main --------------------------------------
if __name__ == "__main__":
    n_label = 60
    key = jax.random.PRNGKey(0)
    kp, kx1, kx2 = jax.random.split(key, 3)
    params = init_params(kp, n_label=n_label)
    forward = make_linear_classifier_cnn(params, n_label)   # params packed once

    # Small-batch path (fc1 pipelined over K, everything else resident in VMEM).
    x_small = jax.random.normal(kx1, (8, 2048), jnp.float32)
    out_small = jax.block_until_ready(forward(x_small))
    assert out_small.shape == (8, n_label), out_small.shape
    assert jnp.allclose(out_small, reference_bf16(x_small, params),
                        atol=5e-3, rtol=5e-3)
    assert jnp.allclose(out_small, reference_f32(x_small, params),
                        atol=3e-2, rtol=3e-2)

    # Batch-tiled path (grid over batch tiles, resident weights, two-pass BN,
    # bf16 hidden scratch); B=520 with tm=512 exercises the partial-tile mask.
    x_big = jax.random.normal(kx2, (520, 2048), jnp.float32)
    out_big = jax.block_until_ready(forward(x_big))
    assert out_big.shape == (520, n_label), out_big.shape
    assert jnp.allclose(out_big, reference_bf16(x_big, params, bf16_hidden=True),
                        atol=5e-3, rtol=5e-3)
    assert jnp.allclose(out_big, reference_f32(x_big, params),
                        atol=3e-2, rtol=3e-2)

    print("KERNEL_OK")
</pallas_src>

<mosaic_0001>
module attributes {stable_mosaic.version = 11 : i64} {
  func.func @_fused_kernel(%arg0: i32, %arg1: memref<8x512xf32, #tpu.memory_space<vmem>>, %arg2: memref<512x1024xbf16, #tpu.memory_space<vmem>>, %arg3: memref<1x1024xf32, #tpu.memory_space<vmem>>, %arg4: memref<1x1024xf32, #tpu.memory_space<vmem>>, %arg5: memref<1024x256xbf16, #tpu.memory_space<vmem>>, %arg6: memref<1x256xf32, #tpu.memory_space<vmem>>, %arg7: memref<1x256xf32, #tpu.memory_space<vmem>>, %arg8: memref<256x128xbf16, #tpu.memory_space<vmem>>, %arg9: memref<1x128xf32, #tpu.memory_space<vmem>>, %arg10: memref<8x128xf32, #tpu.memory_space<vmem>>, %arg11: memref<8x1024xf32, #tpu.memory_space<vmem>>) attributes {dimension_semantics = [#tpu.dimension_semantics<arbitrary>], iteration_bounds = array<i64: 4>, scalar_prefetch = 0 : i64, scratch_operands = 1 : i64, tpu.core_type = #tpu.core_type<tc>, window_params = [{transform_indices = @transform_0, window_bounds = array<i64: 8, 512>}, {transform_indices = @transform_1, window_bounds = array<i64: 512, 1024>}, {pipeline_mode = #tpu.pipeline_mode<synchronous>, transform_indices = @transform_2, window_bounds = array<i64: 1, 1024>}, {pipeline_mode = #tpu.pipeline_mode<synchronous>, transform_indices = @transform_3, window_bounds = array<i64: 1, 1024>}, {pipeline_mode = #tpu.pipeline_mode<synchronous>, transform_indices = @transform_4, window_bounds = array<i64: 1024, 256>}, {pipeline_mode = #tpu.pipeline_mode<synchronous>, transform_indices = @transform_5, window_bounds = array<i64: 1, 256>}, {pipeline_mode = #tpu.pipeline_mode<synchronous>, transform_indices = @transform_6, window_bounds = array<i64: 1, 256>}, {pipeline_mode = #tpu.pipeline_mode<synchronous>, transform_indices = @transform_7, window_bounds = array<i64: 256, 128>}, {pipeline_mode = #tpu.pipeline_mode<synchronous>, transform_indices = @transform_8, window_bounds = array<i64: 1, 128>}, {pipeline_mode = #tpu.pipeline_mode<synchronous>, transform_indices = @transform_9, window_bounds = array<i64: 8, 128>}]} {
    %c0_i32 = arith.constant 0 : i32
    %0 = arith.cmpi eq, %arg0, %c0_i32 : i32
    %1 = arith.extui %0 : i1 to i32
    %c0_i32_0 = arith.constant 0 : i32
    %2 = arith.cmpi ne, %1, %c0_i32_0 : i32
    scf.if %2 {
      %cst_9 = arith.constant 0.000000e+00 : f32
      %13 = vector.broadcast %cst_9 : f32 to vector<8x1024xf32>
      %c0_10 = arith.constant 0 : index
      %c0_11 = arith.constant 0 : index
      %14 = vector.load %arg11[%c0_10, %c0_11] : memref<8x1024xf32, #tpu.memory_space<vmem>>, vector<8x1024xf32>
      tpu.vector_store %arg11[%c0_10, %c0_11], %13 {strides = array<i32>} : memref<8x1024xf32, #tpu.memory_space<vmem>>, vector<8x1024xf32>,
    } else {
    }
    %c0 = arith.constant 0 : index
    %c0_1 = arith.constant 0 : index
    %3 = vector.load %arg11[%c0, %c0_1] : memref<8x1024xf32, #tpu.memory_space<vmem>>, vector<8x1024xf32>
    %c0_2 = arith.constant 0 : index
    %c0_3 = arith.constant 0 : index
    %4 = vector.load %arg1[%c0_2, %c0_3] : memref<8x512xf32, #tpu.memory_space<vmem>>, vector<8x512xf32>
    %5 = arith.truncf %4 : vector<8x512xf32> to vector<8x512xbf16>
    %c0_4 = arith.constant 0 : index
    %c0_5 = arith.constant 0 : index
    %6 = vector.load %arg2[%c0_4, %c0_5] : memref<512x1024xbf16, #tpu.memory_space<vmem>>, vector<512x1024xbf16>
    %cst = arith.constant dense<0.000000e+00> : vector<8x1024xf32>
    %7 = tpu.matmul %5, %6, %cst {dimension_numbers = #tpu.dot_dimension_numbers<[1], [0], [0], [1], [0, 0, 1, 1], [], []>} : vector<8x512xbf16>, vector<512x1024xbf16>, vector<8x1024xf32> -> vector<8x1024xf32>
    %8 = arith.addf %3, %7 : vector<8x1024xf32>
    %c0_6 = arith.constant 0 : index
    %c0_7 = arith.constant 0 : index
    %9 = vector.load %arg11[%c0_6, %c0_7] : memref<8x1024xf32, #tpu.memory_space<vmem>>, vector<8x1024xf32>
    tpu.vector_store %arg11[%c0_6, %c0_7], %8 {strides = array<i32>} : memref<8x1024xf32, #tpu.memory_space<vmem>>, vector<8x1024xf32>,
    %c3_i32 = arith.constant 3 : i32
    %10 = arith.cmpi eq, %arg0, %c3_i32 : i32
    %11 = arith.extui %10 : i1 to i32
    %c0_i32_8 = arith.constant 0 : i32
    %12 = arith.cmpi ne, %11, %c0_i32_8 : i32
    scf.if %12 {
      %c0_9 = arith.constant 0 : index
      %c0_10 = arith.constant 0 : index
      %13 = vector.load %arg11[%c0_9, %c0_10] : memref<8x1024xf32, #tpu.memory_space<vmem>>, vector<8x1024xf32>
      %c0_11 = arith.constant 0 : index
      %c0_12 = arith.constant 0 : index
      %14 = vector.load %arg3[%c0_11, %c0_12] : memref<1x1024xf32, #tpu.memory_space<vmem>>, vector<1x1024xf32>
      %c0_13 = arith.constant 0 : index
      %c0_14 = arith.constant 0 : index
      %15 = vector.load %arg4[%c0_13, %c0_14] : memref<1x1024xf32, #tpu.memory_space<vmem>>, vector<1x1024xf32>
      %cst_15 = arith.constant dense<0.000000e+00> : vector<1024xf32>
      %16 = vector.multi_reduction <add>, %13, %cst_15 [0] : vector<8x1024xf32> to vector<1024xf32>
      %17 = vector.shape_cast %16 : vector<1024xf32> to vector<1x1024xf32>
      %cst_16 = arith.constant 8.000000e+00 : f32
      %18 = vector.broadcast %cst_16 : f32 to vector<1x1024xf32>
      %19 = arith.divf %17, %18 : vector<1x1024xf32>
      %20 = vector.broadcast %19 : vector<1x1024xf32> to vector<8x1024xf32>
      %21 = arith.subf %13, %20 : vector<8x1024xf32>
      %22 = arith.mulf %21, %21 : vector<8x1024xf32>
      %cst_17 = arith.constant dense<0.000000e+00> : vector<1024xf32>
      %23 = vector.multi_reduction <add>, %22, %cst_17 [0] : vector<8x1024xf32> to vector<1024xf32>
      %24 = vector.shape_cast %23 : vector<1024xf32> to vector<1x1024xf32>
      %cst_18 = arith.constant 8.000000e+00 : f32
      %25 = vector.broadcast %cst_18 : f32 to vector<1x1024xf32>
      %26 = arith.divf %24, %25 : vector<1x1024xf32>
      %27 = vector.broadcast %19 : vector<1x1024xf32> to vector<8x1024xf32>
      %28 = arith.subf %13, %27 : vector<8x1024xf32>
      %cst_19 = arith.constant 1.000000e-03 : f32
      %29 = vector.broadcast %cst_19 : f32 to vector<1x1024xf32>
      %30 = arith.addf %26, %29 : vector<1x1024xf32>
      %31 = math.rsqrt %30 : vector<1x1024xf32>
      %32 = vector.broadcast %31 : vector<1x1024xf32> to vector<8x1024xf32>
      %33 = arith.mulf %28, %32 : vector<8x1024xf32>
      %34 = vector.broadcast %14 : vector<1x1024xf32> to vector<8x1024xf32>
      %35 = arith.mulf %33, %34 : vector<8x1024xf32>
      %36 = vector.broadcast %15 : vector<1x1024xf32> to vector<8x1024xf32>
      %37 = arith.addf %35, %36 : vector<8x1024xf32>
      %cst_20 = arith.constant 0.000000e+00 : f32
      %38 = vector.broadcast %cst_20 : f32 to vector<8x1024xf32>
      %39 = arith.maximumf %37, %38 : vector<8x1024xf32>
      %40 = arith.truncf %39 : vector<8x1024xf32> to vector<8x1024xbf16>
      %c0_21 = arith.constant 0 : index
      %c0_22 = arith.constant 0 : index
      %41 = vector.load %arg5[%c0_21, %c0_22] : memref<1024x256xbf16, #tpu.memory_space<vmem>>, vector<1024x256xbf16>
      %cst_23 = arith.constant dense<0.000000e+00> : vector<8x256xf32>
      %42 = tpu.matmul %40, %41, %cst_23 {dimension_numbers = #tpu.dot_dimension_numbers<[1], [0], [0], [1], [0, 0, 1, 1], [], []>} : vector<8x1024xbf16>, vector<1024x256xbf16>, vector<8x256xf32> -> vector<8x256xf32>
      %c0_24 = arith.constant 0 : index
      %c0_25 = arith.constant 0 : index
      %43 = vector.load %arg6[%c0_24, %c0_25] : memref<1x256xf32, #tpu.memory_space<vmem>>, vector<1x256xf32>
      %c0_26 = arith.constant 0 : index
      %c0_27 = arith.constant 0 : index
      %44 = vector.load %arg7[%c0_26, %c0_27] : memref<1x256xf32, #tpu.memory_space<vmem>>, vector<1x256xf32>
      %cst_28 = arith.constant dense<0.000000e+00> : vector<256xf32>
      %45 = vector.multi_reduction <add>, %42, %cst_28 [0] : vector<8x256xf32> to vector<256xf32>
      %46 = vector.shape_cast %45 : vector<256xf32> to vector<1x256xf32>
      %cst_29 = arith.constant 8.000000e+00 : f32
      %47 = vector.broadcast %cst_29 : f32 to vector<1x256xf32>
      %48 = arith.divf %46, %47 : vector<1x256xf32>
      %49 = vector.broadcast %48 : vector<1x256xf32> to vector<8x256xf32>
      %50 = arith.subf %42, %49 : vector<8x256xf32>
      %51 = arith.mulf %50, %50 : vector<8x256xf32>
      %cst_30 = arith.constant dense<0.000000e+00> : vector<256xf32>
      %52 = vector.multi_reduction <add>, %51, %cst_30 [0] : vector<8x256xf32> to vector<256xf32>
      %53 = vector.shape_cast %52 : vector<256xf32> to vector<1x256xf32>
      %cst_31 = arith.constant 8.000000e+00 : f32
      %54 = vector.broadcast %cst_31 : f32 to vector<1x256xf32>
      %55 = arith.divf %53, %54 : vector<1x256xf32>
      %56 = vector.broadcast %48 : vector<1x256xf32> to vector<8x256xf32>
      %57 = arith.subf %42, %56 : vector<8x256xf32>
      %cst_32 = arith.constant 1.000000e-03 : f32
      %58 = vector.broadcast %cst_32 : f32 to vector<1x256xf32>
      %59 = arith.addf %55, %58 : vector<1x256xf32>
      %60 = math.rsqrt %59 : vector<1x256xf32>
      %61 = vector.broadcast %60 : vector<1x256xf32> to vector<8x256xf32>
      %62 = arith.mulf %57, %61 : vector<8x256xf32>
      %63 = vector.broadcast %43 : vector<1x256xf32> to vector<8x256xf32>
      %64 = arith.mulf %62, %63 : vector<8x256xf32>
      %65 = vector.broadcast %44 : vector<1x256xf32> to vector<8x256xf32>
      %66 = arith.addf %64, %65 : vector<8x256xf32>
      %cst_33 = arith.constant 0.000000e+00 : f32
      %67 = vector.broadcast %cst_33 : f32 to vector<8x256xf32>
      %68 = arith.maximumf %66, %67 : vector<8x256xf32>
      %69 = arith.truncf %68 : vector<8x256xf32> to vector<8x256xbf16>
      %c0_34 = arith.constant 0 : index
      %c0_35 = arith.constant 0 : index
      %70 = vector.load %arg8[%c0_34, %c0_35] : memref<256x128xbf16, #tpu.memory_space<vmem>>, vector<256x128xbf16>
      %cst_36 = arith.constant dense<0.000000e+00> : vector<8x128xf32>
      %71 = tpu.matmul %69, %70, %cst_36 {dimension_numbers = #tpu.dot_dimension_numbers<[1], [0], [0], [1], [0, 0, 1, 1], [], []>} : vector<8x256xbf16>, vector<256x128xbf16>, vector<8x128xf32> -> vector<8x128xf32>
      %c0_37 = arith.constant 0 : index
      %c0_38 = arith.constant 0 : index
      %72 = vector.load %arg9[%c0_37, %c0_38] : memref<1x128xf32, #tpu.memory_space<vmem>>, vector<1x128xf32>
      %73 = vector.broadcast %72 : vector<1x128xf32> to vector<8x128xf32>
      %74 = arith.addf %71, %73 : vector<8x128xf32>
      %c0_39 = arith.constant 0 : index
      %c0_40 = arith.constant 0 : index
      %75 = vector.load %arg10[%c0_39, %c0_40] : memref<8x128xf32, #tpu.memory_space<vmem>>, vector<8x128xf32>
      tpu.vector_store %arg10[%c0_39, %c0_40], %74 {strides = array<i32>} : memref<8x128xf32, #tpu.memory_space<vmem>>, vector<8x128xf32>,
    } else {
    }
    return
  }
  func.func @transform_0(%arg0: i32) -> (i32, i32) {
    %c0_i32 = arith.constant 0 : i32
    %c0_i32_0 = arith.constant 0 : i32
    return %c0_i32, %arg0 : i32, i32
  }
  func.func @transform_1(%arg0: i32) -> (i32, i32) {
    %c0_i32 = arith.constant 0 : i32
    %c0_i32_0 = arith.constant 0 : i32
    return %arg0, %c0_i32 : i32, i32
  }
  func.func @transform_2(%arg0: i32) -> (i32, i32) {
    %c0_i32 = arith.constant 0 : i32
    %c0_i32_0 = arith.constant 0 : i32
    %c0_i32_1 = arith.constant 0 : i32
    return %c0_i32, %c0_i32_0 : i32, i32
  }
  func.func @transform_3(%arg0: i32) -> (i32, i32) {
    %c0_i32 = arith.constant 0 : i32
    %c0_i32_0 = arith.constant 0 : i32
    %c0_i32_1 = arith.constant 0 : i32
    return %c0_i32, %c0_i32_0 : i32, i32
  }
  func.func @transform_4(%arg0: i32) -> (i32, i32) {
    %c0_i32 = arith.constant 0 : i32
    %c0_i32_0 = arith.constant 0 : i32
    %c0_i32_1 = arith.constant 0 : i32
    return %c0_i32, %c0_i32_0 : i32, i32
  }
  func.func @transform_5(%arg0: i32) -> (i32, i32) {
    %c0_i32 = arith.constant 0 : i32
    %c0_i32_0 = arith.constant 0 : i32
    %c0_i32_1 = arith.constant 0 : i32
    return %c0_i32, %c0_i32_0 : i32, i32
  }
  func.func @transform_6(%arg0: i32) -> (i32, i32) {
    %c0_i32 = arith.constant 0 : i32
    %c0_i32_0 = arith.constant 0 : i32
    %c0_i32_1 = arith.constant 0 : i32
    return %c0_i32, %c0_i32_0 : i32, i32
  }
  func.func @transform_7(%arg0: i32) -> (i32, i32) {
    %c0_i32 = arith.constant 0 : i32
    %c0_i32_0 = arith.constant 0 : i32
    %c0_i32_1 = arith.constant 0 : i32
    return %c0_i32, %c0_i32_0 : i32, i32
  }
  func.func @transform_8(%arg0: i32) -> (i32, i32) {
    %c0_i32 = arith.constant 0 : i32
    %c0_i32_0 = arith.constant 0 : i32
    %c0_i32_1 = arith.constant 0 : i32
    return %c0_i32, %c0_i32_0 : i32, i32
  }
  func.func @transform_9(%arg0: i32) -> (i32, i32) {
    %c0_i32 = arith.constant 0 : i32
    %c0_i32_0 = arith.constant 0 : i32
    %c0_i32_1 = arith.constant 0 : i32
    return %c0_i32, %c0_i32_0 : i32, i32
  }
}

</mosaic_0001>

<bundles_post_ra>
// kernel: tpu_custom_call.1
= control target key start
LH: loop header
LB: loop body
LE: loop exit
PB: predicated region body
PF: predicated region fallthrough
CT: control target
= control target key end

     0   :  { %s5873_s0 = inlined_call_operand.hbm [shape: f32[8,2048], index: 0, kind: input, shape index: {}]   ;;  %s5874_s1 = inlined_call_operand.hbm [shape: bf16[2048,1024], index: 1, kind: input, shape index: {}]   ;;  %s5875_s2 = inlined_call_operand.hbm [shape: f32[1,1024], index: 2, kind: input, shape index: {}]   ;;  %s5876_s3 = inlined_call_operand.hbm [shape: f32[1,1024], index: 3, kind: input, shape index: {}]   ;;  %s5877_s4 = inlined_call_operand.hbm [shape: bf16[1024,256], index: 4, kind: input, shape index: {}]   ;;  %s5878_s5 = inlined_call_operand.hbm [shape: f32[1,256], index: 5, kind: input, shape index: {}]   ;;  %s5879_s6 = inlined_call_operand.hbm [shape: f32[1,256], index: 6, kind: input, shape index: {}]   ;;  %s5880_s7 = inlined_call_operand.hbm [shape: bf16[256,128], index: 7, kind: input, shape index: {}]   ;;  %s5881_s8 = inlined_call_operand.hbm [shape: f32[1,128], index: 8, kind: input, shape index: {}]   ;;  %s5882_s9 = inlined_call_operand.hbm [shape: f32[8,128], index: 9, kind: output, shape index: {}]  }
   0x1   :  { %5885 = sst [smem:[#allocation26_spill]] %s5873_s0 }
   0x2   :  { %5886 = sst [smem:[#allocation27_spill]] %s5875_s2 }
   0x3   :  { %14 = vsyncpa [#allocation4], 0 }
   0x4   :  { %16 = vsyncpa [#allocation4 + $0x1], 0 }
   0x5   :  { %17 = vsyncpa [#allocation7], 0 }
   0x6   :  { %19 = vsyncpa [#allocation7 + $0x1], 0 }
   0x7   :  { %20 = vsyncpa [#allocation10], 0 }
   0x8   :  { %21 = vsyncpa [#allocation13], 0 }
   0x9   :  { %22 = vsyncpa [#allocation16], 0 }
   0xa   :  { %23 = vsyncpa [#allocation5], 0  ;;  %s5190_s30 = smov 0   ;;  %s5192_s10 = smov 0  }
   0xb   :  { %s5194_s11 = smov 0   ;;  %s5196_s12 = smov 0  }
   0xc LB: > { %s5123_s13 = smov [#allocation8]   ;;  %s5211_s15 = sadd.s32 4294967295, %s5121_s12   ;;  %s5121_s12 = sphi %s5196_s12, %s5910_s12   ;;  %s5117_s11 = sphi %s5194_s11, %s5909_s11   ;;  %s5113_s10 = sphi %s5192_s10, %s5908_s10   ;;  %s5109_s30 = sphi %s5190_s30, %s5907_s30  }
   0xd   : > { %s267_s14 = sshll.u32 %s5123_s13, 4  ;;  %p3986_p0 = scmp.ge.s32.totalorder %s5121_s12, 1  ;;  %s268_s14 = int_to_ptr.vmem [resolvable:$true] %s267_s14 }
   0xe   : > { %p5883_p1 = scmp.eq.s32.totalorder %s5211_s15, 0  ;;  %p254_p2 = scmp.lt.s32.totalorder %s5121_s12, 5 }
   0xf   : > { %s5124_s17 = smov [#allocation9]   ;;  %s5125_s19 = smov [#allocation12]  }
  0x10   : > { %p5217_p4 = pnand %p3986_p0, %p254_p2  ;;  %s278_s18 = sshll.u32 %s5124_s17, 4  ;;  %s279_s18 = int_to_ptr.vmem [resolvable:$true] %s278_s18 }
  0x11   : > { %s302_s20 = sshll.u32 %s5125_s19, 4  ;;  %s5126_s22 = smov [#allocation15]   ;;  %s5229_s20 = int_to_ptr.vmem [resolvable:$true] %s302_s20 }
  0x12   : > { %s5887_s16 = scalar_select %p5217_p4, 1, 0 }
  0x13   : > { %p4480_p5 = pneg %p5217_p4  ;;  %s5231_s23 = sshll.u32 %s5126_s22, 4  ;;  %s324_s23 = int_to_ptr.vmem [resolvable:$true] %s5231_s23 }
  0x14   : > { %s4812_s25 = scalar_lea.vmem %s268_s14, 128  ;;  %p4820_p11 = scmp.lt.s32.totalorder %s268_s14, %s268_s14 }
  0x15   : > { %p5225_p6 = pnand %p4480_p5, %p5883_p1  ;;  %p4813_p8 = scmp.ne.s32.totalorder %s268_s14, %s4812_s25 }
  0x16   : > { %p4821_p12 = scmp.lt.s32.totalorder %s4812_s25, %s4812_s25 }
  0x17   : > { %p5235_p7 = pneg %p5225_p6 }
  0x18   : > { %p4822_p13 = por %p4821_p12, %p4820_p11 }
  0x19   : > { %p4815_p9 = pnand %p4813_p8, %p5235_p7 }
  0x1b   : > { %p4816_p10 = pneg %p4815_p9 }
  0x1d   : > { %p4823_p0 = pnand %p4822_p13, %p4816_p10 }
  0x1f   : > { %4826 = shalt.err (!%p4823_p0)
}
  0x20   : > { %s5890_s2 = sld [smem:[#allocation27_spill]]  ;;  %s4838_s28 = scalar_lea.vmem %s279_s18, 128 }
  0x21   : > { %p4839_p2 = scmp.ne.s32.totalorder %s279_s18, %s4838_s28  ;;  %p4846_p1 = scmp.lt.s32.totalorder %s279_s18, %s279_s18 }
  0x22   : > { %p4847_p8 = scmp.lt.s32.totalorder %s4838_s28, %s4838_s28 }
  0x23   : > { %p4841_p5 = pnand %p4839_p2, %p5235_p7 }
  0x24   : > { %p4848_p9 = por %p4847_p8, %p4846_p1 }
  0x25   : > { %p4842_p3 = pneg %p4841_p5 }
  0x26   : > { %4483 = dma.hbm_to_vmem [thread:$0]  (!%p5225_p6), %s5890_s2, 128, %s268_s14, [#allocation7]  }
  0x27   : > { %p4849_p4 = pnand %p4848_p9, %p4842_p3 }
  0x29   : > { %4852 = shalt.err (!%p4849_p4)
}
  0x2a   : > { %4486 = dma.hbm_to_vmem [thread:$0]  (!%p5225_p6), %s5876_s3, 128, %s279_s18, [#allocation10]  }
  0x2b   : > { %s4864_s14 = scalar_lea.vmem %s5229_s20, 32  ;;  %p4872_p13 = scmp.lt.s32.totalorder %s5229_s20, %s5229_s20 }
  0x2c   : > { %p4865_p10 = scmp.ne.s32.totalorder %s5229_s20, %s4864_s14  ;;  %p4873_p1 = scmp.lt.s32.totalorder %s4864_s14, %s4864_s14 }
  0x2e   : > { %p4867_p11 = pnand %p4865_p10, %p5235_p7  ;;  %p4874_p3 = por %p4873_p1, %p4872_p13 }
  0x30   : > { %p4868_p12 = pneg %p4867_p11 }
  0x32   : > { %p4875_p4 = pnand %p4874_p3, %p4868_p12 }
  0x34   : > { %4878 = shalt.err (!%p4875_p4)
}
  0x35   : > { %4492 = dma.hbm_to_vmem [thread:$0]  (!%p5225_p6), %s5878_s5, 32, %s5229_s20, [#allocation13]  }
  0x36   : > { %s4890_s18 = scalar_lea.vmem %s324_s23, 2048  ;;  %p4898_p8 = scmp.lt.s32.totalorder %s324_s23, %s324_s23 }
  0x37   : > { %p4891_p0 = scmp.ne.s32.totalorder %s324_s23, %s4890_s18  ;;  %p4899_p9 = scmp.lt.s32.totalorder %s4890_s18, %s4890_s18 }
  0x39   : > { %p4893_p2 = pnand %p4891_p0, %p5235_p7  ;;  %p4900_p10 = por %p4899_p9, %p4898_p8 }
  0x3b   : > { %p4894_p5 = pneg %p4893_p2 }
  0x3d   : > { %p4901_p11 = pnand %p4900_p10, %p4894_p5 }
  0x3f   : > { %4904 = shalt.err (!%p4901_p11)
}
  0x40   : > { %s5127_s22 = smov 64   ;;  %s5128_s25 = smov 4  }
  0x41   : > { %4498 = dma.hbm_to_vmem [thread:$0]  (!%p5225_p6), %s5880_s7, 2048, %s324_s23, [#allocation16], %s5127_s22, %s5127_s22, %s5128_s25  }
  0x42   : > { %s5129_s20 = smov [#allocation11]  }
  0x43   : > { %s288_s28 = sshll.u32 %s5129_s20, 4  ;;  %s289_s28 = int_to_ptr.vmem [resolvable:$true] %s288_s28 }
  0x44   : > { %s4916_s29 = scalar_lea.vmem %s289_s28, 16384  ;;  %p4924_p3 = scmp.lt.s32.totalorder %s289_s28, %s289_s28 }
  0x45   : > { %p4917_p12 = scmp.ne.s32.totalorder %s289_s28, %s4916_s29  ;;  %p4925_p4 = scmp.lt.s32.totalorder %s4916_s29, %s4916_s29 }
  0x47   : > { %p4919_p13 = pnand %p4917_p12, %p5235_p7  ;;  %p4926_p0 = por %p4925_p4, %p4924_p3 }
  0x49   : > { %p4920_p1 = pneg %p4919_p13 }
  0x4b   : > { %p4927_p2 = pnand %p4926_p0, %p4920_p1 }
  0x4d   : > { %4930 = shalt.err (!%p4927_p2)
}
  0x4e   : > { %s5130_s13 = smov 128   ;;  %s5131_s14 = smov 8  }
  0x4f   : > { %4489 = dma.hbm_to_vmem [thread:$0]  (!%p5225_p6), %s5877_s4, 16384, %s289_s28, [#allocation10], %s5130_s13, %s5130_s13, %s5131_s14  }
  0x50   : > { %s5132_s19 = smov [#allocation14]   ;;  %s5133_s22 = smov [#allocation17]  }
  0x51   : > { %s313_s18 = sshll.u32 %s5132_s19, 4  ;;  %s337_s25 = sshll.u32 %s5133_s22, 4  ;;  %s314_s18 = int_to_ptr.vmem [resolvable:$true] %s313_s18  ;;  %s338_s25 = int_to_ptr.vmem [resolvable:$true] %s337_s25 }
  0x52   : > { %s4942_s26 = scalar_lea.vmem %s314_s18, 32  ;;  %p4950_p10 = scmp.lt.s32.totalorder %s314_s18, %s314_s18 }
  0x53   : > { %p4943_p5 = scmp.ne.s32.totalorder %s314_s18, %s4942_s26  ;;  %p4951_p11 = scmp.lt.s32.totalorder %s4942_s26, %s4942_s26 }
  0x55   : > { %p4945_p8 = pnand %p4943_p5, %p5235_p7  ;;  %p4952_p12 = por %p4951_p11, %p4950_p10 }
  0x57   : > { %p4946_p9 = pneg %p4945_p8 }
  0x59   : > { %p4953_p13 = pnand %p4952_p12, %p4946_p9 }
  0x5b   : > { %4956 = shalt.err (!%p4953_p13)
}
  0x5c   : > { %4495 = dma.hbm_to_vmem [thread:$0]  (!%p5225_p6), %s5879_s6, 32, %s314_s18, [#allocation13]  }
  0x5d   : > { %s4968_s28 = scalar_lea.vmem %s338_s25, 16  ;;  %s4975_s29 = scalar_lea.vmem %s338_s25, 32 }
  0x5e   : > { %p4969_p1 = scmp.ne.s32.totalorder %s338_s25, %s4968_s28  ;;  %p4976_p0 = scmp.lt.s32.totalorder %s338_s25, %s338_s25 }
  0x5f   : > { %p4977_p2 = scmp.lt.s32.totalorder %s4975_s29, %s4968_s28 }
  0x60   : > { %p4971_p3 = pnand %p4969_p1, %p5235_p7 }
  0x61   : > { %p4978_p5 = por %p4977_p2, %p4976_p0 }
  0x62   : > { %p4972_p4 = pneg %p4971_p3 }
  0x64   : > { %p4979_p8 = pnand %p4978_p5, %p4972_p4 }
  0x66   : > { %4982 = shalt.err (!%p4979_p8)
}
  0x67   : > { %4501 = dma.hbm_to_vmem [thread:$0]  (!%p5225_p6), %s5881_s8, 16, %s338_s25, [#allocation16]  }
  0x68   : > { %s5295_s24 = sadd.s32 1, %s5121_s12   ;;  %s36_s17 = sadd.s32 1, %s5117_s11 }
  0x69   : > { %s33_s21 = ssub.s32 %s5121_s12, %s5295_s24  ;;  %p43_p9 = scmp.ne.s32.totalorder %s5117_s11, %s5113_s10 }
  0x6a   : > { %p34_p7 = scmp.eq.s32.totalorder %s33_s21, 0  ;;  %p44_p10 = scmp.eq.s32.totalorder %s5121_s12, 0 }
  0x6b   : > { %p49_p11 = scmp.ne.s32.totalorder %s5113_s10, %s5109_s30  ;;  %p5891_p13 = scmp.eq.s32.totalorder %s5211_s15, 0 }
  0x6c   : > { %s5306_s23 = scalar_select %p34_p7, %s5117_s11, %s36_s17  }
  0x6d   : > { %p45_p12 = por %p44_p10, %p43_p9  ;;  %p5310_p1 = por %p5891_p13, %p49_p11 }
  0x6e   : > { %p4516_p3 = scmp.lt.s32.totalorder %s5121_s12, 4  ;;  %s5316_s18 = sand.u32 1, %s5117_s11  }
  0x6f   : > { %s3995_s22 = sshll.u32 %s5316_s18, 5  ;;  %s4419_s25 = sshll.u32 %s5121_s12, 9 }
  0x70   : > { %s5893_s0 = sld [smem:[#allocation26_spill]]  ;;  %s352_s20 = scalar_lea.vmem [#allocation3], %s3995_s22 }
  0x71   : > { %s360_s28 = sshll.u32 %s352_s20, 4  ;;  %p5327_p6 = pnand %p4516_p3, %p45_p12  ;;  %s5325_s28 = int_to_ptr.vmem [resolvable:$true] %s360_s28 }
  0x72   : > { %s349_s21 = scalar_lea.sflag [#allocation4], %s5316_s18 }
  0x73   : > { %p4985_p0 = pneg %p5327_p6 }
  0x76   : > { %s5323_s30 = scalar_lea.hbm %s5893_s0, %s4419_s25  ;;  %s4988_s26 = scalar_lea.hbm %s5893_s0, 2048 }
  0x77   : > { %s4983_s17 = scalar_lea.hbm %s5323_s30, 512  ;;  %p4989_p8 = scmp.lt.s32.totalorder %s5323_s30, %s5893_s0 }
  0x78   : > { %p4984_p4 = scmp.ne.s32.totalorder %s5323_s30, %s4983_s17  ;;  %p4990_p7 = scmp.lt.s32.totalorder %s4988_s26, %s4983_s17 }
  0x7a   : > { %p4986_p2 = pnand %p4985_p0, %p4984_p4  ;;  %p4991_p9 = por %p4990_p7, %p4989_p8 }
  0x7c   : > { %p4987_p5 = pneg %p4986_p2 }
  0x7e   : > { %p4992_p10 = pnand %p4991_p9, %p4987_p5 }
  0x80   : > { %4995 = shalt.err (!%p4992_p10)
}
  0x81   : > { %s4996_s14 = scalar_lea.vmem %s5325_s28, 512  ;;  %s5134_s22 = smov [#allocation3]  }
  0x82   : > { %p4997_p11 = scmp.ne.s32.totalorder %s5325_s28, %s4996_s14  ;;  %s5001_s25 = sshll.u32 %s5134_s22, 4  ;;  %s5002_s25 = int_to_ptr.vmem [resolvable:$false] %s5001_s25 }
  0x83   : > { %s5003_s13 = scalar_lea.vmem %s5002_s25, 1024  ;;  %p5004_p3 = scmp.lt.s32.totalorder %s5325_s28, %s5002_s25 }
  0x84   : > { %p4999_p12 = pnand %p4997_p11, %p4985_p0  ;;  %p5005_p4 = scmp.lt.s32.totalorder %s5003_s13, %s4996_s14 }
  0x86   : > { %p5000_p13 = pneg %p4999_p12  ;;  %p5006_p2 = por %p5005_p4, %p5004_p3 }
  0x88   : > { %p5007_p8 = pnand %p5006_p2, %p5000_p13 }
  0x8a   : > { %5010 = shalt.err (!%p5007_p8)
}
  0x8b   : > { %4505 = dma.hbm_to_vmem [thread:$0]  (!%p5327_p6), %s5323_s30, 512, %s5325_s28, %s349_s21  }
  0x8c   : > { %s5895_s17 = sshll.u32 %s5316_s18, 11  ;;  %s4421_s20 = sshll.u32 %s5121_s12, 15 }
  0x8d   : > { %s371_s26 = scalar_lea.vmem [#allocation6], %s5895_s17  ;;  %s5366_s14 = scalar_lea.hbm %s5874_s1, %s4421_s20 }
  0x8e   : > { %s379_s27 = sshll.u32 %s371_s26, 4  ;;  %s5896_s25 = sand.u32 1, %s5121_s12   ;;  %s5360_s27 = int_to_ptr.vmem [resolvable:$true] %s379_s27 }
  0x8f   : > { %s5370_s0 = scalar_lea.sflag [#allocation7], %s5896_s25  ;;  %s5011_s2 = scalar_lea.hbm %s5366_s14, 32768 }
  0x90   : > { %p5012_p5 = scmp.ne.s32.totalorder %s5366_s14, %s5011_s2  ;;  %s5016_s28 = scalar_lea.hbm %s5874_s1, 131072 }
  0x91   : > { %p5017_p10 = scmp.lt.s32.totalorder %s5366_s14, %s5874_s1  ;;  %p5018_p11 = scmp.lt.s32.totalorder %s5016_s28, %s5011_s2 }
  0x92   : > { %p5014_p7 = pnand %p5012_p5, %p4985_p0 }
  0x93   : > { %p5019_p12 = por %p5018_p11, %p5017_p10 }
  0x94   : > { %p5015_p9 = pneg %p5014_p7 }
  0x96   : > { %p5020_p13 = pnand %p5019_p12, %p5015_p9 }
  0x98   : > { %5023 = shalt.err (!%p5020_p13)
}
  0x99   : > { %s5024_s12 = scalar_lea.vmem %s5360_s27, 32768  ;;  %s5135_s26 = smov [#allocation6]  }
  0x9a   : > { %p5025_p3 = scmp.ne.s32.totalorder %s5360_s27, %s5024_s12  ;;  %s5029_s20 = sshll.u32 %s5135_s26, 4  ;;  %s5030_s20 = int_to_ptr.vmem [resolvable:$false] %s5029_s20 }
  0x9b   : > { %s5031_s22 = scalar_lea.vmem %s5030_s20, 65536  ;;  %p5032_p8 = scmp.lt.s32.totalorder %s5360_s27, %s5030_s20 }
  0x9c   : > { %p5027_p4 = pnand %p5025_p3, %p4985_p0  ;;  %p5033_p5 = scmp.lt.s32.totalorder %s5031_s22, %s5024_s12 }
  0x9e   : > { %p5028_p2 = pneg %p5027_p4  ;;  %p5034_p7 = por %p5033_p5, %p5032_p8 }
  0xa0   : > { %p5035_p10 = pnand %p5034_p7, %p5028_p2 }
  0xa2   : > { %5038 = shalt.err (!%p5035_p10)
}
  0xa3   : > { %s5136_s2 = smov 512   ;;  %s5137_s13 = smov 32  }
  0xa4   : > { %4508 = dma.hbm_to_vmem [thread:$0]  (!%p5327_p6), %s5366_s14, 32768, %s5360_s27, %s5370_s0, %s5136_s2, %s5136_s2, %s5137_s13  }
  0xa5   : > { %p5897_p0 = scmp.ne.s32.totalorder %s5887_s16, 0 }
  0xa6   : > { %s393_s25 = sand.u32 (!%p5897_p0), 1, %s5113_s10  }
  0xa7   : > { %391 = sbr.rel (%p5897_p0) target bundleno = 1289 (0x509), region = 56  ;;  %s4003_s18 = sshll.u32 (!%p5897_p0), %s393_s25, 5 }
  0xa8   : > { %s394_s30 = scalar_lea.sflag (!%p5897_p0), [#allocation4], %s393_s25  ;;  %s5398_s28 = scalar_lea.vmem (!%p5897_p0), [#allocation3], %s4003_s18 }
  0xac   : > { %5080 = dma.done.wait (%p5310_p1), %s394_s30, 512  }
  0xad   : > { %5082 = vsyncadd (%p5310_p1), %s394_s30, 4294966784  ;;  %s402_s21 = sand.u32 1, %s5211_s15   ;;  %s4004_s29 = sshll.u32 %s393_s25, 11 }
  0xae   : > { %s403_s0 = scalar_lea.sflag [#allocation7], %s402_s21  ;;  %s5405_s27 = scalar_lea.vmem [#allocation6], %s4004_s29 }
  0xaf   : > { %5084 = dma.done.wait (%p5310_p1), %s403_s0, 32768  }
  0xb0   : > { %5086 = vsyncadd (%p5310_p1), %s403_s0, 4294934528  ;;  %p5898_p6 = scmp.eq.s32.totalorder %s5211_s15, 0 }
  0xb2   : > { %5088 = dma.done.wait (%p5898_p6), [#allocation7], 128   ;;  %p5899_p9 = pmov %p5898_p6 }
  0xb3   : > { %p5900_p11 = pmov %p5898_p6 }
  0xb4   : > { %5090 = vsyncadd (%p5899_p9), [#allocation7], 4294967168 }
  0xb5   : > { %5092 = dma.done.wait (%p5900_p11), [#allocation10], 16512   ;;  %p5901_p12 = pmov %p5898_p6 }
  0xb6   : > { %p5902_p13 = pmov %p5898_p6 }
  0xb7   : > { %5094 = vsyncadd (%p5901_p12), [#allocation10], 4294950784 }
  0xb8   : > { %5096 = dma.done.wait (%p5902_p13), [#allocation13], 64   ;;  %p5903_p3 = pmov %p5898_p6 }
  0xba   : > { %5098 = vsyncadd (%p5903_p3), [#allocation13], 4294967232  ;;  %p5904_p1 = pmov %p5903_p3 }
  0xbc   : > { %5100 = dma.done.wait (%p5904_p1), [#allocation16], 2064   ;;  %p5905_p4 = pmov %p5904_p1 }
  0xbd   : > { %p5906_p2 = scmp.ne.s32.totalorder %s5211_s15, 0 }
  0xbe   : > { %5102 = vsyncadd (%p5905_p4), [#allocation16], 4294965232 }
  0xbf   : > { %475 = sbr.rel (%p5906_p2) target bundleno = 201 (0xc9), region = 96 }
  0xc4   : > { %v5138_v0 = vmov 0.0  }
  0xc5   : > { %476 = vst [vmem:[#allocation2 + $0x30] sm:$0xff] %v5138_v0  ;;  %477 = vst [vmem:[#allocation2] sm:$0xff] %v5138_v0 }
  0xc6   : > { %478 = vst [vmem:[#allocation2 + $0x18] sm:$0xff] %v5138_v0  ;;  %479 = vst [vmem:[#allocation2 + $0x10] sm:$0xff] %v5138_v0 }
  0xc7   : > { %480 = vst [vmem:[#allocation2 + $0x8] sm:$0xff] %v5138_v0  ;;  %481 = vst [vmem:[#allocation2 + $0x20] sm:$0xff] %v5138_v0 }
  0xc8   : > { %482 = vst [vmem:[#allocation2 + $0x28] sm:$0xff] %v5138_v0  ;;  %483 = vst [vmem:[#allocation2 + $0x38] sm:$0xff] %v5138_v0 }
  0xc9 PF: > { %v556_v1 = vld [vmem:[%s5405_s27 + $0x1c0] sm:$0xff]  ;;  %v493_v54 = vld [vmem:[%s5398_s28 + $0x8] sm:$0xff]  ;;  %v495_v55 = vld [vmem:[%s5398_s28 + $0x18] sm:$0xff]  ;;  %p4269_p8 = scmp.ne.s32.totalorder %s5211_s15, 3 }
  0xca   : > { %v560_v2 = vld [vmem:[%s5405_s27 + $0x1e0] sm:$0xff]  ;;  %v5461_v59 = vpack.c.bf16 %v493_v54, %v493_v54  ;;  %v5463_v60 = vpack.c.bf16 %v495_v55, %v495_v55 }
  0xcb   : > { %v684_v3 = vld [vmem:[%s5405_s27 + $0x5c0] sm:$0xff]  ;;  %v4070_v4 = vcombine.high %v556_v1, %v560_v2  ;;  %v4069_v6 = vcombine.low %v556_v1, %v560_v2 }
  0xcc   : > { %v688_v5 = vld [vmem:[%s5405_s27 + $0x5e0] sm:$0xff]  ;;  %2068 = vmatprep.mubr.bf16.mxu0 %v5461_v59  ;;  %2109 = vmatprep.mubr.bf16.mxu1 %v5463_v60 }
  0xcd   : > { %v548_v7 = vld [vmem:[%s5405_s27 + $0x180] sm:$0xff]  ;;  %v4198_v9 = vcombine.high %v684_v3, %v688_v5  ;;  %v4197_v10 = vcombine.low %v684_v3, %v688_v5  ;;  %2036 = vmatprep.subr.bf16.mxu0 %v4070_v4 }
  0xce   : > { %v552_v8 = vld [vmem:[%s5405_s27 + $0x1a0] sm:$0xff]  ;;  %2037 = vmatpush1.bf16.msra.mxu0 %v4069_v6 }
  0xcf   : > { %v4062_v11 = vcombine.high %v548_v7, %v552_v8  ;;  %v676_v12 = vld [vmem:[%s5405_s27 + $0x580] sm:$0xff]  ;;  %2077 = vmatprep.subr.bf16.mxu1 %v4198_v9  ;;  %v4061_v19 = vcombine.low %v548_v7, %v552_v8 }
  0xd0   : > { %v680_v13 = vld [vmem:[%s5405_s27 + $0x5a0] sm:$0xff]  ;;  %2078 = vmatpush1.bf16.msra.mxu1 %v4197_v10 }
  0xd1   : > { %v540_v14 = vld [vmem:[%s5405_s27 + $0x140] sm:$0xff]  ;;  %v4190_v15 = vcombine.high %v676_v12, %v680_v13  ;;  %2038 = vmatprep.subr.bf16.mxu0 %v4062_v11  ;;  %v4189_v20 = vcombine.low %v676_v12, %v680_v13 }
  0xd2   : > { %v544_v16 = vld [vmem:[%s5405_s27 + $0x160] sm:$0xff]  ;;  %2039 = vmatpush1.bf16.msra.mxu0 %v4061_v19 }
  0xd3   : > { %v668_v17 = vld [vmem:[%s5405_s27 + $0x540] sm:$0xff]  ;;  %v4054_v21 = vcombine.high %v540_v14, %v544_v16  ;;  %2079 = vmatprep.subr.bf16.mxu1 %v4190_v15  ;;  %v4053_v27 = vcombine.low %v540_v14, %v544_v16 }
  0xd4   : > { %v672_v18 = vld [vmem:[%s5405_s27 + $0x560] sm:$0xff]  ;;  %2080 = vmatpush1.bf16.msra.mxu1 %v4189_v20 }
  0xd5   : > { %v4182_v22 = vcombine.high %v668_v17, %v672_v18  ;;  %v532_v23 = vld [vmem:[%s5405_s27 + $0x100] sm:$0xff]  ;;  %2040 = vmatprep.subr.bf16.mxu0 %v4054_v21  ;;  %v4181_v28 = vcombine.low %v668_v17, %v672_v18 }
  0xd6   : > { %v536_v24 = vld [vmem:[%s5405_s27 + $0x120] sm:$0xff]  ;;  %2041 = vmatpush1.bf16.msra.mxu0 %v4053_v27 }
  0xd7   : > { %v660_v25 = vld [vmem:[%s5405_s27 + $0x500] sm:$0xff]  ;;  %v4046_v29 = vcombine.high %v532_v23, %v536_v24  ;;  %2081 = vmatprep.subr.bf16.mxu1 %v4182_v22  ;;  %v4045_v35 = vcombine.low %v532_v23, %v536_v24 }
  0xd8   : > { %v664_v26 = vld [vmem:[%s5405_s27 + $0x520] sm:$0xff]  ;;  %2082 = vmatpush1.bf16.msra.mxu1 %v4181_v28 }
  0xd9   : > { %v4174_v30 = vcombine.high %v660_v25, %v664_v26  ;;  %v524_v31 = vld [vmem:[%s5405_s27 + $0xc0] sm:$0xff]  ;;  %2042 = vmatprep.subr.bf16.mxu0 %v4046_v29  ;;  %v4173_v36 = vcombine.low %v660_v25, %v664_v26 }
  0xda   : > { %v528_v32 = vld [vmem:[%s5405_s27 + $0xe0] sm:$0xff]  ;;  %2043 = vmatpush1.bf16.msra.mxu0 %v4045_v35 }
  0xdb   : > { %v652_v33 = vld [vmem:[%s5405_s27 + $0x4c0] sm:$0xff]  ;;  %v4038_v37 = vcombine.high %v524_v31, %v528_v32  ;;  %2083 = vmatprep.subr.bf16.mxu1 %v4174_v30  ;;  %v4037_v43 = vcombine.low %v524_v31, %v528_v32 }
  0xdc   : > { %v656_v34 = vld [vmem:[%s5405_s27 + $0x4e0] sm:$0xff]  ;;  %2084 = vmatpush1.bf16.msra.mxu1 %v4173_v36 }
  0xdd   : > { %v4166_v38 = vcombine.high %v652_v33, %v656_v34  ;;  %v516_v39 = vld [vmem:[%s5405_s27 + $0x80] sm:$0xff]  ;;  %2044 = vmatprep.subr.bf16.mxu0 %v4038_v37  ;;  %v4165_v44 = vcombine.low %v652_v33, %v656_v34 }
  0xde   : > { %v520_v40 = vld [vmem:[%s5405_s27 + $0xa0] sm:$0xff]  ;;  %2045 = vmatpush1.bf16.msra.mxu0 %v4037_v43 }
  0xdf   : > { %v644_v41 = vld [vmem:[%s5405_s27 + $0x480] sm:$0xff]  ;;  %v4030_v45 = vcombine.high %v516_v39, %v520_v40  ;;  %2085 = vmatprep.subr.bf16.mxu1 %v4166_v38  ;;  %v4029_v51 = vcombine.low %v516_v39, %v520_v40 }
  0xe0   : > { %v648_v42 = vld [vmem:[%s5405_s27 + $0x4a0] sm:$0xff]  ;;  %2086 = vmatpush1.bf16.msra.mxu1 %v4165_v44 }
  0xe1   : > { %v4158_v46 = vcombine.high %v644_v41, %v648_v42  ;;  %v508_v47 = vld [vmem:[%s5405_s27 + $0x40] sm:$0xff]  ;;  %2046 = vmatprep.subr.bf16.mxu0 %v4030_v45  ;;  %v4157_v52 = vcombine.low %v644_v41, %v648_v42 }
  0xe2   : > { %v512_v48 = vld [vmem:[%s5405_s27 + $0x60] sm:$0xff]  ;;  %2047 = vmatpush1.bf16.msra.mxu0 %v4029_v51 }
  0xe3   : > { %v636_v49 = vld [vmem:[%s5405_s27 + $0x440] sm:$0xff]  ;;  %v4022_v53 = vcombine.high %v508_v47, %v512_v48  ;;  %2087 = vmatprep.subr.bf16.mxu1 %v4158_v46  ;;  %v4021_v63 = vcombine.low %v508_v47, %v512_v48 }
  0xe4   : > { %v640_v50 = vld [vmem:[%s5405_s27 + $0x460] sm:$0xff]  ;;  %2088 = vmatpush1.bf16.msra.mxu1 %v4157_v52 }
  0xe5   : > { %v4150_v56 = vcombine.high %v636_v49, %v640_v50  ;;  %v500_v57 = vld [vmem:[%s5405_s27] sm:$0xff]  ;;  %2048 = vmatprep.subr.bf16.mxu0 %v4022_v53  ;;  %v4149_v0 = vcombine.low %v636_v49, %v640_v50 }
  0xe6   : > { %v504_v58 = vld [vmem:[%s5405_s27 + $0x20] sm:$0xff]  ;;  %2049 = vmatpush1.bf16.msra.mxu0 %v4021_v63 }
  0xe7   : > { %v628_v61 = vld [vmem:[%s5405_s27 + $0x400] sm:$0xff]  ;;  %v4014_v1 = vcombine.high %v500_v57, %v504_v58  ;;  %2089 = vmatprep.subr.bf16.mxu1 %v4150_v56  ;;  %v4013_v7 = vcombine.low %v500_v57, %v504_v58 }
  0xe8   : > { %v632_v62 = vld [vmem:[%s5405_s27 + $0x420] sm:$0xff]  ;;  %2090 = vmatpush1.bf16.msra.mxu1 %v4149_v0 }
  0xe9   : > { %v4142_v2 = vcombine.high %v628_v61, %v632_v62  ;;  %v620_v3 = vld [vmem:[%s5405_s27 + $0x3c0] sm:$0xff]  ;;  %2050 = vmatprep.subr.bf16.mxu0 %v4014_v1  ;;  %v4141_v8 = vcombine.low %v628_v61, %v632_v62 }
  0xea   : > { %v624_v4 = vld [vmem:[%s5405_s27 + $0x3e0] sm:$0xff]  ;;  %2051 = vmatpush1.bf16.msra.mxu0 %v4013_v7  ;;  %v685_v7 = vld [vmem:[%s5405_s27 + $0x5c8] sm:$0xff] }
  0xeb   : > { %v748_v5 = vld [vmem:[%s5405_s27 + $0x7c0] sm:$0xff]  ;;  %v4134_v9 = vcombine.high %v620_v3, %v624_v4  ;;  %2091 = vmatprep.subr.bf16.mxu1 %v4142_v2  ;;  %v4133_v15 = vcombine.low %v620_v3, %v624_v4 }
  0xec   : > { %v752_v6 = vld [vmem:[%s5405_s27 + $0x7e0] sm:$0xff]  ;;  %2092 = vmatpush1.bf16.msra.mxu1 %v4141_v8  ;;  %v689_v8 = vld [vmem:[%s5405_s27 + $0x5e8] sm:$0xff] }
  0xed   : > { %v4262_v10 = vcombine.high %v748_v5, %v752_v6  ;;  %v612_v11 = vld [vmem:[%s5405_s27 + $0x380] sm:$0xff]  ;;  %2052 = vmatprep.subr.bf16.mxu0 %v4134_v9  ;;  %v4261_v16 = vcombine.low %v748_v5, %v752_v6  ;;  %v557_v5 = vld [vmem:[%s5405_s27 + $0x1c8] sm:$0xff] }
  0xee   : > { %v616_v12 = vld [vmem:[%s5405_s27 + $0x3a0] sm:$0xff]  ;;  %2053 = vmatpush2.bf16.msra.mxu0 %v4133_v15  ;;  %v561_v6 = vld [vmem:[%s5405_s27 + $0x1e8] sm:$0xff] }
  0xef   : > { %v740_v13 = vld [vmem:[%s5405_s27 + $0x780] sm:$0xff]  ;;  %v4126_v17 = vcombine.high %v612_v11, %v616_v12  ;;  %2093 = vmatprep.subr.bf16.mxu1 %v4262_v10  ;;  %v4125_v23 = vcombine.low %v612_v11, %v616_v12  ;;  %v494_v12 = vld [vmem:[%s5398_s28 + $0x10] sm:$0xff]  ;;  %v549_v15 = vld [vmem:[%s5405_s27 + $0x188] sm:$0xff] }
  0xf0   : > { %v744_v14 = vld [vmem:[%s5405_s27 + $0x7a0] sm:$0xff]  ;;  %2094 = vmatpush2.bf16.msra.mxu1 %v4261_v16  ;;  %v553_v16 = vld [vmem:[%s5405_s27 + $0x1a8] sm:$0xff] }
  0xf1   : > { %v4254_v18 = vcombine.high %v740_v13, %v744_v14  ;;  %v604_v19 = vld [vmem:[%s5405_s27 + $0x340] sm:$0xff]  ;;  %2054 = vmatprep.subr.bf16.mxu0 %v4126_v17  ;;  %v4253_v24 = vcombine.low %v740_v13, %v744_v14  ;;  %v4072_v13 = vcombine.high %v557_v5, %v561_v6  ;;  %v4200_v14 = vcombine.high %v685_v7, %v689_v8 }
  0xf2   : > { %v608_v20 = vld [vmem:[%s5405_s27 + $0x360] sm:$0xff]  ;;  %2055 = vmatpush2.bf16.msra.mxu0 %v4125_v23  ;;  %v4064_v23 = vcombine.high %v549_v15, %v553_v16 }
  0xf3   : > { %v732_v21 = vld [vmem:[%s5405_s27 + $0x740] sm:$0xff]  ;;  %v4118_v25 = vcombine.high %v604_v19, %v608_v20  ;;  %2095 = vmatprep.subr.bf16.mxu1 %v4254_v18  ;;  %v4117_v31 = vcombine.low %v604_v19, %v608_v20  ;;  %v677_v18 = vld [vmem:[%s5405_s27 + $0x588] sm:$0xff]  ;;  %v5513_v20 = vpack.c.bf16 %v494_v12, %v494_v12 }
  0xf4   : > { %v736_v22 = vld [vmem:[%s5405_s27 + $0x760] sm:$0xff]  ;;  %2096 = vmatpush2.bf16.msra.mxu1 %v4253_v24  ;;  %v681_v19 = vld [vmem:[%s5405_s27 + $0x5a8] sm:$0xff] }
  0xf5   : > { %v4246_v26 = vcombine.high %v732_v21, %v736_v22  ;;  %v596_v27 = vld [vmem:[%s5405_s27 + $0x300] sm:$0xff]  ;;  %2056 = vmatprep.subr.bf16.mxu0 %v4118_v25  ;;  %v4245_v32 = vcombine.low %v732_v21, %v736_v22  ;;  %v4071_v21 = vcombine.low %v557_v5, %v561_v6  ;;  %v4199_v22 = vcombine.low %v685_v7, %v689_v8  ;;  %v541_v25 = vld [vmem:[%s5405_s27 + $0x148] sm:$0xff] }
  0xf6   : > { %v600_v28 = vld [vmem:[%s5405_s27 + $0x320] sm:$0xff]  ;;  %2057 = vmatpush2.bf16.msra.mxu0 %v4117_v31  ;;  %v4192_v24 = vcombine.high %v677_v18, %v681_v19  ;;  %v629_v5 = vld [vmem:[%s5405_s27 + $0x408] sm:$0xff] }
  0xf7   : > { %v724_v29 = vld [vmem:[%s5405_s27 + $0x700] sm:$0xff]  ;;  %v4110_v33 = vcombine.high %v596_v27, %v600_v28  ;;  %2097 = vmatprep.subr.bf16.mxu1 %v4246_v26  ;;  %v4109_v39 = vcombine.low %v596_v27, %v600_v28  ;;  %v545_v26 = vld [vmem:[%s5405_s27 + $0x168] sm:$0xff] }
  0xf8   : > { %v728_v30 = vld [vmem:[%s5405_s27 + $0x720] sm:$0xff]  ;;  %2098 = vmatpush2.bf16.msra.mxu1 %v4245_v32  ;;  %v669_v27 = vld [vmem:[%s5405_s27 + $0x548] sm:$0xff]  ;;  %v4056_v31 = vcombine.high %v541_v25, %v545_v26 }
  0xf9   : > { %v4238_v34 = vcombine.high %v724_v29, %v728_v30  ;;  %v588_v35 = vld [vmem:[%s5405_s27 + $0x2c0] sm:$0xff]  ;;  %2058 = vmatprep.subr.bf16.mxu0 %v4110_v33  ;;  %v4237_v40 = vcombine.low %v724_v29, %v728_v30  ;;  %v673_v28 = vld [vmem:[%s5405_s27 + $0x568] sm:$0xff]  ;;  %v4063_v29 = vcombine.low %v549_v15, %v553_v16  ;;  %v4191_v30 = vcombine.low %v677_v18, %v681_v19 }
  0xfa   : > { %v592_v36 = vld [vmem:[%s5405_s27 + $0x2e0] sm:$0xff]  ;;  %2059 = vmatpush2.bf16.msra.mxu0 %v4109_v39  ;;  %v4184_v32 = vcombine.high %v669_v27, %v673_v28  ;;  %v533_v33 = vld [vmem:[%s5405_s27 + $0x108] sm:$0xff] }
  0xfb   : > { %v716_v37 = vld [vmem:[%s5405_s27 + $0x6c0] sm:$0xff]  ;;  %v4102_v41 = vcombine.high %v588_v35, %v592_v36  ;;  %2099 = vmatprep.subr.bf16.mxu1 %v4238_v34  ;;  %v4101_v47 = vcombine.low %v588_v35, %v592_v36  ;;  %v537_v34 = vld [vmem:[%s5405_s27 + $0x128] sm:$0xff] }
  0xfc   : > { %v720_v38 = vld [vmem:[%s5405_s27 + $0x6e0] sm:$0xff]  ;;  %2100 = vmatpush2.bf16.msra.mxu1 %v4237_v40  ;;  %v661_v35 = vld [vmem:[%s5405_s27 + $0x508] sm:$0xff]  ;;  %v4048_v39 = vcombine.high %v533_v33, %v537_v34 }
  0xfd   : > { %v4230_v42 = vcombine.high %v716_v37, %v720_v38  ;;  %v580_v43 = vld [vmem:[%s5405_s27 + $0x280] sm:$0xff]  ;;  %2060 = vmatprep.subr.bf16.mxu0 %v4102_v41  ;;  %v4229_v48 = vcombine.low %v716_v37, %v720_v38  ;;  %v665_v36 = vld [vmem:[%s5405_s27 + $0x528] sm:$0xff]  ;;  %v4055_v37 = vcombine.low %v541_v25, %v545_v26  ;;  %v4183_v38 = vcombine.low %v669_v27, %v673_v28 }
  0xfe   : > { %v584_v44 = vld [vmem:[%s5405_s27 + $0x2a0] sm:$0xff]  ;;  %2061 = vmatpush2.bf16.msra.mxu0 %v4101_v47  ;;  %v4176_v40 = vcombine.high %v661_v35, %v665_v36  ;;  %v525_v41 = vld [vmem:[%s5405_s27 + $0xc8] sm:$0xff] }
  0xff   : > { %v708_v45 = vld [vmem:[%s5405_s27 + $0x680] sm:$0xff]  ;;  %v4094_v49 = vcombine.high %v580_v43, %v584_v44  ;;  %2101 = vmatprep.subr.bf16.mxu1 %v4230_v42  ;;  %v4093_v55 = vcombine.low %v580_v43, %v584_v44  ;;  %v529_v42 = vld [vmem:[%s5405_s27 + $0xe8] sm:$0xff] }
 0x100   : > { %v712_v46 = vld [vmem:[%s5405_s27 + $0x6a0] sm:$0xff]  ;;  %2102 = vmatpush2.bf16.msra.mxu1 %v4229_v48  ;;  %v653_v43 = vld [vmem:[%s5405_s27 + $0x4c8] sm:$0xff]  ;;  %v4040_v47 = vcombine.high %v525_v41, %v529_v42 }
 0x101   : > { %v4222_v50 = vcombine.high %v708_v45, %v712_v46  ;;  %v572_v51 = vld [vmem:[%s5405_s27 + $0x240] sm:$0xff]  ;;  %2062 = vmatprep.subr.bf16.mxu0 %v4094_v49  ;;  %v4221_v56 = vcombine.low %v708_v45, %v712_v46  ;;  %v657_v44 = vld [vmem:[%s5405_s27 + $0x4e8] sm:$0xff]  ;;  %v4047_v45 = vcombine.low %v533_v33, %v537_v34  ;;  %v4175_v46 = vcombine.low %v661_v35, %v665_v36 }
 0x102   : > { %v576_v52 = vld [vmem:[%s5405_s27 + $0x260] sm:$0xff]  ;;  %2063 = vmatpush2.bf16.msra.mxu0 %v4093_v55  ;;  %v4168_v48 = vcombine.high %v653_v43, %v657_v44  ;;  %v517_v49 = vld [vmem:[%s5405_s27 + $0x88] sm:$0xff] }
 0x103   : > { %v700_v53 = vld [vmem:[%s5405_s27 + $0x640] sm:$0xff]  ;;  %v4086_v57 = vcombine.high %v572_v51, %v576_v52  ;;  %2103 = vmatprep.subr.bf16.mxu1 %v4222_v50  ;;  %v4085_v1 = vcombine.low %v572_v51, %v576_v52  ;;  %v521_v50 = vld [vmem:[%s5405_s27 + $0xa8] sm:$0xff] }
 0x104   : > { %v704_v54 = vld [vmem:[%s5405_s27 + $0x660] sm:$0xff]  ;;  %2104 = vmatpush2.bf16.msra.mxu1 %v4221_v56  ;;  %v645_v51 = vld [vmem:[%s5405_s27 + $0x488] sm:$0xff]  ;;  %v4032_v55 = vcombine.high %v517_v49, %v521_v50 }
 0x105   : > { %v4214_v58 = vcombine.high %v700_v53, %v704_v54  ;;  %v564_v61 = vld [vmem:[%s5405_s27 + $0x200] sm:$0xff]  ;;  %2064 = vmatprep.subr.bf16.mxu0 %v4086_v57  ;;  %v4213_v2 = vcombine.low %v700_v53, %v704_v54  ;;  %v649_v52 = vld [vmem:[%s5405_s27 + $0x4a8] sm:$0xff]  ;;  %v4039_v53 = vcombine.low %v525_v41, %v529_v42  ;;  %v4167_v54 = vcombine.low %v653_v43, %v657_v44 }
 0x106   : > { %v568_v62 = vld [vmem:[%s5405_s27 + $0x220] sm:$0xff]  ;;  %2065 = vmatpush2.bf16.msra.mxu0 %v4085_v1  ;;  %v4160_v56 = vcombine.high %v645_v51, %v649_v52  ;;  %v509_v57 = vld [vmem:[%s5405_s27 + $0x48] sm:$0xff] }
 0x107   : > { %v692_v63 = vld [vmem:[%s5405_s27 + $0x600] sm:$0xff]  ;;  %v4078_v3 = vcombine.high %v564_v61, %v568_v62  ;;  %2105 = vmatprep.subr.bf16.mxu1 %v4214_v58  ;;  %v4077_v9 = vcombine.low %v564_v61, %v568_v62  ;;  %v513_v58 = vld [vmem:[%s5405_s27 + $0x68] sm:$0xff] }
 0x108   : > { %v696_v0 = vld [vmem:[%s5405_s27 + $0x620] sm:$0xff]  ;;  %2106 = vmatpush2.bf16.msra.mxu1 %v4213_v2  ;;  %v637_v61 = vld [vmem:[%s5405_s27 + $0x448] sm:$0xff]  ;;  %v4024_v1 = vcombine.high %v509_v57, %v513_v58  ;;  %v4023_v7 = vcombine.low %v509_v57, %v513_v58 }
 0x109   : > { %v4206_v4 = vcombine.high %v692_v63, %v696_v0  ;;  %v492_v10 = vld [vmem:[%s5398_s28] sm:$0xff]  ;;  %2066 = vmatprep.subr.bf16.mxu0 %v4078_v3  ;;  %v4205_v11 = vcombine.low %v692_v63, %v696_v0  ;;  %v641_v62 = vld [vmem:[%s5405_s27 + $0x468] sm:$0xff]  ;;  %v4031_v63 = vcombine.low %v517_v49, %v521_v50  ;;  %v4159_v0 = vcombine.low %v645_v51, %v649_v52 }
 0x10a   : > { %v5509_v17 = vpack.c.bf16 %v492_v10, %v492_v10  ;;  %2067 = vmatpush2.bf16.msra.mxu0 %v4077_v9  ;;  %v4152_v2 = vcombine.high %v637_v61, %v641_v62  ;;  %v501_v3 = vld [vmem:[%s5405_s27 + $0x8] sm:$0xff]  ;;  %v4151_v8 = vcombine.low %v637_v61, %v641_v62 }
 0x10b   : > { %2107 = vmatprep.subr.bf16.mxu1 %v4206_v4  ;;  %2118 = vmatprep.subr.bf16.mxu0 %v4072_v13  ;;  %v505_v4 = vld [vmem:[%s5405_s27 + $0x28] sm:$0xff] }
 0x10c   : > { %2108 = vmatpush2.bf16.msra.mxu1 %v4205_v11  ;;  %v633_v6 = vld [vmem:[%s5405_s27 + $0x428] sm:$0xff]  ;;  %v4016_v9 = vcombine.high %v501_v3, %v505_v4  ;;  %v4015_v15 = vcombine.low %v501_v3, %v505_v4 }
 0x10d   : > { %2159 = vmatprep.subr.bf16.mxu1 %v4200_v14  ;;  %2069 = vmatmul.mubr.bf16.vlgmr.msra.gmra.mxu0 %v5509_v17  ;;  %v4144_v10 = vcombine.high %v629_v5, %v633_v6  ;;  %v621_v11 = vld [vmem:[%s5405_s27 + $0x3c8] sm:$0xff]  ;;  %v4143_v16 = vcombine.low %v629_v5, %v633_v6 }
 0x10e   : > { %2119 = vmatpush1.bf16.msra.mxu0 %v4071_v21  ;;  %2150 = vmatprep.mubr.bf16.mxu0 %v5461_v59  ;;  %v625_v12 = vld [vmem:[%s5405_s27 + $0x3e8] sm:$0xff] }
 0x10f   : > { %2110 = vmatmul.mubr.bf16.vlgmr.msra.gmra.mxu1 %v5513_v20  ;;  %2120 = vmatprep.subr.bf16.mxu0 %v4064_v23  ;;  %v749_v13 = vld [vmem:[%s5405_s27 + $0x7c8] sm:$0xff]  ;;  %v4136_v18 = vcombine.high %v621_v11, %v625_v12  ;;  %v4135_v25 = vcombine.low %v621_v11, %v625_v12 }
 0x110   : > { %2160 = vmatpush1.bf16.msra.mxu1 %v4199_v22  ;;  %2191 = vmatprep.mubr.bf16.mxu1 %v5463_v60  ;;  %v753_v14 = vld [vmem:[%s5405_s27 + $0x7e8] sm:$0xff] }
 0x111   : > { %2161 = vmatprep.subr.bf16.mxu1 %v4192_v24  ;;  %v4264_v19 = vcombine.high %v749_v13, %v753_v14  ;;  %v613_v21 = vld [vmem:[%s5405_s27 + $0x388] sm:$0xff]  ;;  %v4263_v26 = vcombine.low %v749_v13, %v753_v14 }
 0x112   : > { %2121 = vmatpush1.bf16.msra.mxu0 %v4063_v29  ;;  %v617_v22 = vld [vmem:[%s5405_s27 + $0x3a8] sm:$0xff] }
 0x113   : > { %2122 = vmatprep.subr.bf16.mxu0 %v4056_v31  ;;  %v741_v23 = vld [vmem:[%s5405_s27 + $0x788] sm:$0xff]  ;;  %v4128_v27 = vcombine.high %v613_v21, %v617_v22  ;;  %v4127_v33 = vcombine.low %v613_v21, %v617_v22 }
 0x114   : > { %2162 = vmatpush1.bf16.msra.mxu1 %v4191_v30  ;;  %v745_v24 = vld [vmem:[%s5405_s27 + $0x7a8] sm:$0xff] }
 0x115   : > { %2163 = vmatprep.subr.bf16.mxu1 %v4184_v32  ;;  %v4256_v28 = vcombine.high %v741_v23, %v745_v24  ;;  %v605_v29 = vld [vmem:[%s5405_s27 + $0x348] sm:$0xff]  ;;  %v4255_v34 = vcombine.low %v741_v23, %v745_v24 }
 0x116   : > { %2123 = vmatpush1.bf16.msra.mxu0 %v4055_v37  ;;  %v609_v30 = vld [vmem:[%s5405_s27 + $0x368] sm:$0xff] }
 0x117   : > { %2124 = vmatprep.subr.bf16.mxu0 %v4048_v39  ;;  %v733_v31 = vld [vmem:[%s5405_s27 + $0x748] sm:$0xff]  ;;  %v4120_v35 = vcombine.high %v605_v29, %v609_v30  ;;  %v4119_v41 = vcombine.low %v605_v29, %v609_v30 }
 0x118   : > { %2164 = vmatpush1.bf16.msra.mxu1 %v4183_v38  ;;  %v737_v32 = vld [vmem:[%s5405_s27 + $0x768] sm:$0xff] }
 0x119   : > { %2165 = vmatprep.subr.bf16.mxu1 %v4176_v40  ;;  %v4248_v36 = vcombine.high %v733_v31, %v737_v32  ;;  %v597_v37 = vld [vmem:[%s5405_s27 + $0x308] sm:$0xff]  ;;  %v4247_v42 = vcombine.low %v733_v31, %v737_v32 }
 0x11a   : > { %2125 = vmatpush1.bf16.msra.mxu0 %v4047_v45  ;;  %v601_v38 = vld [vmem:[%s5405_s27 + $0x328] sm:$0xff] }
 0x11b   : > { %2126 = vmatprep.subr.bf16.mxu0 %v4040_v47  ;;  %v725_v39 = vld [vmem:[%s5405_s27 + $0x708] sm:$0xff]  ;;  %v4112_v43 = vcombine.high %v597_v37, %v601_v38  ;;  %v4111_v49 = vcombine.low %v597_v37, %v601_v38 }
 0x11c   : > { %2166 = vmatpush1.bf16.msra.mxu1 %v4175_v46  ;;  %v729_v40 = vld [vmem:[%s5405_s27 + $0x728] sm:$0xff] }
 0x11d   : > { %2167 = vmatprep.subr.bf16.mxu1 %v4168_v48  ;;  %v4240_v44 = vcombine.high %v725_v39, %v729_v40  ;;  %v589_v45 = vld [vmem:[%s5405_s27 + $0x2c8] sm:$0xff]  ;;  %v4239_v50 = vcombine.low %v725_v39, %v729_v40 }
 0x11e   : > { %2127 = vmatpush1.bf16.msra.mxu0 %v4039_v53  ;;  %v593_v46 = vld [vmem:[%s5405_s27 + $0x2e8] sm:$0xff] }
 0x11f   : > { %2128 = vmatprep.subr.bf16.mxu0 %v4032_v55  ;;  %v717_v47 = vld [vmem:[%s5405_s27 + $0x6c8] sm:$0xff]  ;;  %v4104_v51 = vcombine.high %v589_v45, %v593_v46  ;;  %v4103_v57 = vcombine.low %v589_v45, %v593_v46 }
 0x120   : > { %2168 = vmatpush1.bf16.msra.mxu1 %v4167_v54  ;;  %v721_v48 = vld [vmem:[%s5405_s27 + $0x6e8] sm:$0xff] }
 0x121   : > { %2169 = vmatprep.subr.bf16.mxu1 %v4160_v56  ;;  %v4232_v52 = vcombine.high %v717_v47, %v721_v48  ;;  %v581_v53 = vld [vmem:[%s5405_s27 + $0x288] sm:$0xff]  ;;  %v4231_v58 = vcombine.low %v717_v47, %v721_v48 }
 0x122   : > { %2129 = vmatpush1.bf16.msra.mxu0 %v4031_v63  ;;  %v585_v54 = vld [vmem:[%s5405_s27 + $0x2a8] sm:$0xff] }
 0x123   : > { %2130 = vmatprep.subr.bf16.mxu0 %v4024_v1  ;;  %v709_v55 = vld [vmem:[%s5405_s27 + $0x688] sm:$0xff]  ;;  %v4096_v61 = vcombine.high %v581_v53, %v585_v54  ;;  %v4095_v3 = vcombine.low %v581_v53, %v585_v54 }
 0x124   : > { %2170 = vmatpush1.bf16.msra.mxu1 %v4159_v0  ;;  %v713_v56 = vld [vmem:[%s5405_s27 + $0x6a8] sm:$0xff] }
 0x125   : > { %2171 = vmatprep.subr.bf16.mxu1 %v4152_v2  ;;  %v4224_v62 = vcombine.high %v709_v55, %v713_v56  ;;  %v573_v63 = vld [vmem:[%s5405_s27 + $0x248] sm:$0xff]  ;;  %v4223_v4 = vcombine.low %v709_v55, %v713_v56 }
 0x126   : > { %2131 = vmatpush1.bf16.msra.mxu0 %v4023_v7  ;;  %v577_v0 = vld [vmem:[%s5405_s27 + $0x268] sm:$0xff] }
 0x127   : > { %2132 = vmatprep.subr.bf16.mxu0 %v4016_v9  ;;  %v701_v1 = vld [vmem:[%s5405_s27 + $0x648] sm:$0xff]  ;;  %v4088_v5 = vcombine.high %v573_v63, %v577_v0  ;;  %v4087_v11 = vcombine.low %v573_v63, %v577_v0 }
 0x128   : > { %2172 = vmatpush1.bf16.msra.mxu1 %v4151_v8  ;;  %v705_v2 = vld [vmem:[%s5405_s27 + $0x668] sm:$0xff] }
 0x129   : > { %2173 = vmatprep.subr.bf16.mxu1 %v4144_v10  ;;  %v4216_v6 = vcombine.high %v701_v1, %v705_v2  ;;  %v565_v7 = vld [vmem:[%s5405_s27 + $0x208] sm:$0xff]  ;;  %v4215_v12 = vcombine.low %v701_v1, %v705_v2 }
 0x12a   : > { %2133 = vmatpush1.bf16.msra.mxu0 %v4015_v15  ;;  %v569_v8 = vld [vmem:[%s5405_s27 + $0x228] sm:$0xff]  ;;  %v558_v15 = vld [vmem:[%s5405_s27 + $0x1d0] sm:$0xff] }
 0x12b   : > { %2134 = vmatprep.subr.bf16.mxu0 %v4136_v18  ;;  %v693_v9 = vld [vmem:[%s5405_s27 + $0x608] sm:$0xff]  ;;  %v4080_v13 = vcombine.high %v565_v7, %v569_v8  ;;  %v686_v18 = vld [vmem:[%s5405_s27 + $0x5d0] sm:$0xff]  ;;  %v4079_v21 = vcombine.low %v565_v7, %v569_v8 }
 0x12c   : > { %2174 = vmatpush1.bf16.msra.mxu1 %v4143_v16  ;;  %v697_v10 = vld [vmem:[%s5405_s27 + $0x628] sm:$0xff]  ;;  %v562_v16 = vld [vmem:[%s5405_s27 + $0x1f0] sm:$0xff] }
 0x12d   : > { %2175 = vmatprep.subr.bf16.mxu1 %v4264_v19  ;;  %v4208_v14 = vcombine.high %v693_v9, %v697_v10  ;;  %v690_v19 = vld [vmem:[%s5405_s27 + $0x5f0] sm:$0xff]  ;;  %v4207_v22 = vcombine.low %v693_v9, %v697_v10  ;;  %v4074_v23 = vcombine.high %v558_v15, %v562_v16  ;;  %v4073_v29 = vcombine.low %v558_v15, %v562_v16 }
 0x12e   : > { %2135 = vmatpush2.bf16.msra.mxu0 %v4135_v25  ;;  %v4202_v24 = vcombine.high %v686_v18, %v690_v19  ;;  %v550_v25 = vld [vmem:[%s5405_s27 + $0x190] sm:$0xff]  ;;  %v4201_v30 = vcombine.low %v686_v18, %v690_v19 }
 0x12f   : > { %2136 = vmatprep.subr.bf16.mxu0 %v4128_v27  ;;  %v678_v27 = vld [vmem:[%s5405_s27 + $0x590] sm:$0xff] }
 0x130   : > { %2176 = vmatpush2.bf16.msra.mxu1 %v4263_v26  ;;  %v554_v26 = vld [vmem:[%s5405_s27 + $0x1b0] sm:$0xff] }
 0x131   : > { %2177 = vmatprep.subr.bf16.mxu1 %v4256_v28  ;;  %v682_v28 = vld [vmem:[%s5405_s27 + $0x5b0] sm:$0xff]  ;;  %v4066_v31 = vcombine.high %v550_v25, %v554_v26  ;;  %v4065_v37 = vcombine.low %v550_v25, %v554_v26 }
 0x132   : > { %2137 = vmatpush2.bf16.msra.mxu0 %v4127_v33  ;;  %v4194_v32 = vcombine.high %v678_v27, %v682_v28  ;;  %v542_v33 = vld [vmem:[%s5405_s27 + $0x150] sm:$0xff]  ;;  %v4193_v38 = vcombine.low %v678_v27, %v682_v28 }
 0x133   : > { %2138 = vmatprep.subr.bf16.mxu0 %v4120_v35  ;;  %v670_v35 = vld [vmem:[%s5405_s27 + $0x550] sm:$0xff] }
 0x134   : > { %2178 = vmatpush2.bf16.msra.mxu1 %v4255_v34  ;;  %v546_v34 = vld [vmem:[%s5405_s27 + $0x170] sm:$0xff] }
 0x135   : > { %2179 = vmatprep.subr.bf16.mxu1 %v4248_v36  ;;  %v674_v36 = vld [vmem:[%s5405_s27 + $0x570] sm:$0xff]  ;;  %v4058_v39 = vcombine.high %v542_v33, %v546_v34  ;;  %v4057_v45 = vcombine.low %v542_v33, %v546_v34 }
 0x136   : > { %2139 = vmatpush2.bf16.msra.mxu0 %v4119_v41  ;;  %v4186_v40 = vcombine.high %v670_v35, %v674_v36  ;;  %v534_v41 = vld [vmem:[%s5405_s27 + $0x110] sm:$0xff]  ;;  %v4185_v46 = vcombine.low %v670_v35, %v674_v36 }
 0x137   : > { %2140 = vmatprep.subr.bf16.mxu0 %v4112_v43  ;;  %v662_v43 = vld [vmem:[%s5405_s27 + $0x510] sm:$0xff] }
 0x138   : > { %2180 = vmatpush2.bf16.msra.mxu1 %v4247_v42  ;;  %v538_v42 = vld [vmem:[%s5405_s27 + $0x130] sm:$0xff] }
 0x139   : > { %2181 = vmatprep.subr.bf16.mxu1 %v4240_v44  ;;  %v666_v44 = vld [vmem:[%s5405_s27 + $0x530] sm:$0xff]  ;;  %v4050_v47 = vcombine.high %v534_v41, %v538_v42  ;;  %v4049_v53 = vcombine.low %v534_v41, %v538_v42 }
 0x13a   : > { %2141 = vmatpush2.bf16.msra.mxu0 %v4111_v49  ;;  %v4178_v48 = vcombine.high %v662_v43, %v666_v44  ;;  %v526_v49 = vld [vmem:[%s5405_s27 + $0xd0] sm:$0xff]  ;;  %v4177_v54 = vcombine.low %v662_v43, %v666_v44 }
 0x13b   : > { %2142 = vmatprep.subr.bf16.mxu0 %v4104_v51  ;;  %v654_v51 = vld [vmem:[%s5405_s27 + $0x4d0] sm:$0xff] }
 0x13c   : > { %2182 = vmatpush2.bf16.msra.mxu1 %v4239_v50  ;;  %v530_v50 = vld [vmem:[%s5405_s27 + $0xf0] sm:$0xff] }
 0x13d   : > { %2183 = vmatprep.subr.bf16.mxu1 %v4232_v52  ;;  %v658_v52 = vld [vmem:[%s5405_s27 + $0x4f0] sm:$0xff]  ;;  %v4042_v55 = vcombine.high %v526_v49, %v530_v50  ;;  %v4041_v63 = vcombine.low %v526_v49, %v530_v50 }
 0x13e   : > { %2143 = vmatpush2.bf16.msra.mxu0 %v4103_v57  ;;  %v4170_v56 = vcombine.high %v654_v51, %v658_v52  ;;  %v518_v57 = vld [vmem:[%s5405_s27 + $0x90] sm:$0xff]  ;;  %v4169_v0 = vcombine.low %v654_v51, %v658_v52 }
 0x13f   : > { %2144 = vmatprep.subr.bf16.mxu0 %v4096_v61  ;;  %v646_v61 = vld [vmem:[%s5405_s27 + $0x490] sm:$0xff] }
 0x140   : > { %2184 = vmatpush2.bf16.msra.mxu1 %v4231_v58  ;;  %v522_v58 = vld [vmem:[%s5405_s27 + $0xb0] sm:$0xff] }
 0x141   : > { %2185 = vmatprep.subr.bf16.mxu1 %v4224_v62  ;;  %v650_v62 = vld [vmem:[%s5405_s27 + $0x4b0] sm:$0xff]  ;;  %v4034_v1 = vcombine.high %v518_v57, %v522_v58  ;;  %v4033_v7 = vcombine.low %v518_v57, %v522_v58 }
 0x142   : > { %2145 = vmatpush2.bf16.msra.mxu0 %v4095_v3  ;;  %v4162_v2 = vcombine.high %v646_v61, %v650_v62  ;;  %v510_v3 = vld [vmem:[%s5405_s27 + $0x50] sm:$0xff]  ;;  %v4161_v8 = vcombine.low %v646_v61, %v650_v62 }
 0x143   : > { %2146 = vmatprep.subr.bf16.mxu0 %v4088_v5  ;;  %v638_v5 = vld [vmem:[%s5405_s27 + $0x450] sm:$0xff] }
 0x144   : > { %2186 = vmatpush2.bf16.msra.mxu1 %v4223_v4  ;;  %v514_v4 = vld [vmem:[%s5405_s27 + $0x70] sm:$0xff] }
 0x145   : > { %2187 = vmatprep.subr.bf16.mxu1 %v4216_v6  ;;  %v642_v6 = vld [vmem:[%s5405_s27 + $0x470] sm:$0xff]  ;;  %v4026_v9 = vcombine.high %v510_v3, %v514_v4  ;;  %v4025_v15 = vcombine.low %v510_v3, %v514_v4 }
 0x146   : > { %2147 = vmatpush2.bf16.msra.mxu0 %v4087_v11  ;;  %v4154_v10 = vcombine.high %v638_v5, %v642_v6  ;;  %v502_v11 = vld [vmem:[%s5405_s27 + $0x10] sm:$0xff]  ;;  %v4153_v16 = vcombine.low %v638_v5, %v642_v6 }
 0x147   : > { %2148 = vmatprep.subr.bf16.mxu0 %v4080_v13  ;;  %v630_v13 = vld [vmem:[%s5405_s27 + $0x410] sm:$0xff] }
 0x148   : > { %2188 = vmatpush2.bf16.msra.mxu1 %v4215_v12  ;;  %v506_v12 = vld [vmem:[%s5405_s27 + $0x30] sm:$0xff] }
 0x149   : > { %2189 = vmatprep.subr.bf16.mxu1 %v4208_v14  ;;  %v634_v14 = vld [vmem:[%s5405_s27 + $0x430] sm:$0xff]  ;;  %v4018_v18 = vcombine.high %v502_v11, %v506_v12  ;;  %v4017_v25 = vcombine.low %v502_v11, %v506_v12 }
 0x14a   : > { %2149 = vmatpush2.bf16.msra.mxu0 %v4079_v21  ;;  %v4146_v19 = vcombine.high %v630_v13, %v634_v14  ;;  %v622_v21 = vld [vmem:[%s5405_s27 + $0x3d0] sm:$0xff]  ;;  %v4145_v26 = vcombine.low %v630_v13, %v634_v14 }
 0x14b   : > { %2200 = vmatprep.subr.bf16.mxu0 %v4074_v23  ;;  %v750_v23 = vld [vmem:[%s5405_s27 + $0x7d0] sm:$0xff] }
 0x14c   : > { %2190 = vmatpush2.bf16.msra.mxu1 %v4207_v22  ;;  %v626_v22 = vld [vmem:[%s5405_s27 + $0x3f0] sm:$0xff] }
 0x14d   : > { %2241 = vmatprep.subr.bf16.mxu1 %v4202_v24  ;;  %2151 = vmatmul.mubr.bf16.vlgmr.msra.gmra.mxu0 %v5509_v17  ;;  %v754_v24 = vld [vmem:[%s5405_s27 + $0x7f0] sm:$0xff]  ;;  %v4138_v27 = vcombine.high %v622_v21, %v626_v22  ;;  %v4137_v33 = vcombine.low %v622_v21, %v626_v22 }
 0x14e   : > { %2201 = vmatpush1.bf16.msra.mxu0 %v4073_v29  ;;  %2232 = vmatprep.mubr.bf16.mxu0 %v5461_v59  ;;  %v4266_v28 = vcombine.high %v750_v23, %v754_v24  ;;  %v614_v29 = vld [vmem:[%s5405_s27 + $0x390] sm:$0xff]  ;;  %v4265_v34 = vcombine.low %v750_v23, %v754_v24 }
 0x14f   : > { %2192 = vmatmul.mubr.bf16.vlgmr.msra.gmra.mxu1 %v5513_v20  ;;  %2202 = vmatprep.subr.bf16.mxu0 %v4066_v31  ;;  %v742_v31 = vld [vmem:[%s5405_s27 + $0x790] sm:$0xff] }
 0x150   : > { %2242 = vmatpush1.bf16.msra.mxu1 %v4201_v30  ;;  %2273 = vmatprep.mubr.bf16.mxu1 %v5463_v60  ;;  %v618_v30 = vld [vmem:[%s5405_s27 + $0x3b0] sm:$0xff] }
 0x151   : > { %2243 = vmatprep.subr.bf16.mxu1 %v4194_v32  ;;  %v746_v32 = vld [vmem:[%s5405_s27 + $0x7b0] sm:$0xff]  ;;  %v4130_v35 = vcombine.high %v614_v29, %v618_v30  ;;  %v4129_v41 = vcombine.low %v614_v29, %v618_v30 }
 0x152   : > { %2203 = vmatpush1.bf16.msra.mxu0 %v4065_v37  ;;  %v4258_v36 = vcombine.high %v742_v31, %v746_v32  ;;  %v606_v37 = vld [vmem:[%s5405_s27 + $0x350] sm:$0xff]  ;;  %v4257_v42 = vcombine.low %v742_v31, %v746_v32 }
 0x153   : > { %2204 = vmatprep.subr.bf16.mxu0 %v4058_v39  ;;  %v734_v39 = vld [vmem:[%s5405_s27 + $0x750] sm:$0xff] }
 0x154   : > { %2244 = vmatpush1.bf16.msra.mxu1 %v4193_v38  ;;  %v610_v38 = vld [vmem:[%s5405_s27 + $0x370] sm:$0xff] }
 0x155   : > { %2245 = vmatprep.subr.bf16.mxu1 %v4186_v40  ;;  %v738_v40 = vld [vmem:[%s5405_s27 + $0x770] sm:$0xff]  ;;  %v4122_v43 = vcombine.high %v606_v37, %v610_v38  ;;  %v4121_v49 = vcombine.low %v606_v37, %v610_v38 }
 0x156   : > { %2205 = vmatpush1.bf16.msra.mxu0 %v4057_v45  ;;  %v4250_v44 = vcombine.high %v734_v39, %v738_v40  ;;  %v598_v45 = vld [vmem:[%s5405_s27 + $0x310] sm:$0xff]  ;;  %v4249_v50 = vcombine.low %v734_v39, %v738_v40 }
 0x157   : > { %2206 = vmatprep.subr.bf16.mxu0 %v4050_v47  ;;  %v726_v47 = vld [vmem:[%s5405_s27 + $0x710] sm:$0xff] }
 0x158   : > { %2246 = vmatpush1.bf16.msra.mxu1 %v4185_v46  ;;  %v602_v46 = vld [vmem:[%s5405_s27 + $0x330] sm:$0xff] }
 0x159   : > { %2247 = vmatprep.subr.bf16.mxu1 %v4178_v48  ;;  %v730_v48 = vld [vmem:[%s5405_s27 + $0x730] sm:$0xff]  ;;  %v4114_v51 = vcombine.high %v598_v45, %v602_v46  ;;  %v4113_v57 = vcombine.low %v598_v45, %v602_v46 }
 0x15a   : > { %2207 = vmatpush1.bf16.msra.mxu0 %v4049_v53  ;;  %v4242_v52 = vcombine.high %v726_v47, %v730_v48  ;;  %v590_v53 = vld [vmem:[%s5405_s27 + $0x2d0] sm:$0xff]  ;;  %v4241_v58 = vcombine.low %v726_v47, %v730_v48 }
 0x15b   : > { %2208 = vmatprep.subr.bf16.mxu0 %v4042_v55  ;;  %v718_v55 = vld [vmem:[%s5405_s27 + $0x6d0] sm:$0xff] }
 0x15c   : > { %2248 = vmatpush1.bf16.msra.mxu1 %v4177_v54  ;;  %v594_v54 = vld [vmem:[%s5405_s27 + $0x2f0] sm:$0xff] }
 0x15d   : > { %2249 = vmatprep.subr.bf16.mxu1 %v4170_v56  ;;  %v722_v56 = vld [vmem:[%s5405_s27 + $0x6f0] sm:$0xff]  ;;  %v4106_v61 = vcombine.high %v590_v53, %v594_v54  ;;  %v4105_v3 = vcombine.low %v590_v53, %v594_v54 }
 0x15e   : > { %2209 = vmatpush1.bf16.msra.mxu0 %v4041_v63  ;;  %v4234_v62 = vcombine.high %v718_v55, %v722_v56  ;;  %v582_v63 = vld [vmem:[%s5405_s27 + $0x290] sm:$0xff]  ;;  %v4233_v4 = vcombine.low %v718_v55, %v722_v56 }
 0x15f   : > { %2210 = vmatprep.subr.bf16.mxu0 %v4034_v1  ;;  %v710_v1 = vld [vmem:[%s5405_s27 + $0x690] sm:$0xff] }
 0x160   : > { %2250 = vmatpush1.bf16.msra.mxu1 %v4169_v0  ;;  %v586_v0 = vld [vmem:[%s5405_s27 + $0x2b0] sm:$0xff] }
 0x161   : > { %2251 = vmatprep.subr.bf16.mxu1 %v4162_v2  ;;  %v714_v2 = vld [vmem:[%s5405_s27 + $0x6b0] sm:$0xff]  ;;  %v4098_v5 = vcombine.high %v582_v63, %v586_v0  ;;  %v4097_v11 = vcombine.low %v582_v63, %v586_v0 }
 0x162   : > { %2211 = vmatpush1.bf16.msra.mxu0 %v4033_v7  ;;  %v4226_v6 = vcombine.high %v710_v1, %v714_v2  ;;  %v574_v7 = vld [vmem:[%s5405_s27 + $0x250] sm:$0xff]  ;;  %v4225_v12 = vcombine.low %v710_v1, %v714_v2  ;;  %v519_v1 = vld [vmem:[%s5405_s27 + $0x98] sm:$0xff] }
 0x163   : > { %2212 = vmatprep.subr.bf16.mxu0 %v4026_v9  ;;  %v702_v9 = vld [vmem:[%s5405_s27 + $0x650] sm:$0xff]  ;;  %v523_v2 = vld [vmem:[%s5405_s27 + $0xb8] sm:$0xff] }
 0x164   : > { %2252 = vmatpush1.bf16.msra.mxu1 %v4161_v8  ;;  %v578_v8 = vld [vmem:[%s5405_s27 + $0x270] sm:$0xff] }
 0x165   : > { %2253 = vmatprep.subr.bf16.mxu1 %v4154_v10  ;;  %v706_v10 = vld [vmem:[%s5405_s27 + $0x670] sm:$0xff]  ;;  %v4090_v13 = vcombine.high %v574_v7, %v578_v8  ;;  %v4089_v21 = vcombine.low %v574_v7, %v578_v8  ;;  %v4036_v7 = vcombine.high %v519_v1, %v523_v2 }
 0x166   : > { %2213 = vmatpush1.bf16.msra.mxu0 %v4025_v15  ;;  %v4218_v14 = vcombine.high %v702_v9, %v706_v10  ;;  %v566_v15 = vld [vmem:[%s5405_s27 + $0x210] sm:$0xff]  ;;  %v4217_v22 = vcombine.low %v702_v9, %v706_v10  ;;  %v511_v9 = vld [vmem:[%s5405_s27 + $0x58] sm:$0xff] }
 0x167   : > { %2214 = vmatprep.subr.bf16.mxu0 %v4018_v18  ;;  %v694_v18 = vld [vmem:[%s5405_s27 + $0x610] sm:$0xff]  ;;  %v515_v10 = vld [vmem:[%s5405_s27 + $0x78] sm:$0xff] }
 0x168   : > { %2254 = vmatpush1.bf16.msra.mxu1 %v4153_v16  ;;  %v570_v16 = vld [vmem:[%s5405_s27 + $0x230] sm:$0xff] }
 0x169   : > { %2255 = vmatprep.subr.bf16.mxu1 %v4146_v19  ;;  %v698_v19 = vld [vmem:[%s5405_s27 + $0x630] sm:$0xff]  ;;  %v4082_v23 = vcombine.high %v566_v15, %v570_v16  ;;  %v4081_v29 = vcombine.low %v566_v15, %v570_v16  ;;  %v4028_v15 = vcombine.high %v511_v9, %v515_v10 }
 0x16a   : > { %2215 = vmatpush1.bf16.msra.mxu0 %v4017_v25  ;;  %v4210_v24 = vcombine.high %v694_v18, %v698_v19  ;;  %v559_v25 = vld [vmem:[%s5405_s27 + $0x1d8] sm:$0xff]  ;;  %v4209_v30 = vcombine.low %v694_v18, %v698_v19 }
 0x16b   : > { %2216 = vmatprep.subr.bf16.mxu0 %v4138_v27  ;;  %v687_v27 = vld [vmem:[%s5405_s27 + $0x5d8] sm:$0xff] }
 0x16c   : > { %2256 = vmatpush1.bf16.msra.mxu1 %v4145_v26  ;;  %v563_v26 = vld [vmem:[%s5405_s27 + $0x1f8] sm:$0xff] }
 0x16d   : > { %2257 = vmatprep.subr.bf16.mxu1 %v4266_v28  ;;  %v691_v28 = vld [vmem:[%s5405_s27 + $0x5f8] sm:$0xff]  ;;  %v4076_v31 = vcombine.high %v559_v25, %v563_v26  ;;  %v4075_v37 = vcombine.low %v559_v25, %v563_v26 }
 0x16e   : > { %2217 = vmatpush2.bf16.msra.mxu0 %v4137_v33  ;;  %v4204_v32 = vcombine.high %v687_v27, %v691_v28  ;;  %v551_v33 = vld [vmem:[%s5405_s27 + $0x198] sm:$0xff]  ;;  %v4203_v38 = vcombine.low %v687_v27, %v691_v28 }
 0x16f   : > { %2218 = vmatprep.subr.bf16.mxu0 %v4130_v35  ;;  %v679_v35 = vld [vmem:[%s5405_s27 + $0x598] sm:$0xff] }
 0x170   : > { %2258 = vmatpush2.bf16.msra.mxu1 %v4265_v34  ;;  %v555_v34 = vld [vmem:[%s5405_s27 + $0x1b8] sm:$0xff] }
 0x171   : > { %2259 = vmatprep.subr.bf16.mxu1 %v4258_v36  ;;  %v683_v36 = vld [vmem:[%s5405_s27 + $0x5b8] sm:$0xff]  ;;  %v4068_v39 = vcombine.high %v551_v33, %v555_v34  ;;  %v4067_v45 = vcombine.low %v551_v33, %v555_v34 }
 0x172   : > { %2219 = vmatpush2.bf16.msra.mxu0 %v4129_v41  ;;  %v4196_v40 = vcombine.high %v679_v35, %v683_v36  ;;  %v543_v41 = vld [vmem:[%s5405_s27 + $0x158] sm:$0xff]  ;;  %v4195_v46 = vcombine.low %v679_v35, %v683_v36 }
 0x173   : > { %2220 = vmatprep.subr.bf16.mxu0 %v4122_v43  ;;  %v671_v43 = vld [vmem:[%s5405_s27 + $0x558] sm:$0xff] }
 0x174   : > { %2260 = vmatpush2.bf16.msra.mxu1 %v4257_v42  ;;  %v547_v42 = vld [vmem:[%s5405_s27 + $0x178] sm:$0xff] }
 0x175   : > { %2261 = vmatprep.subr.bf16.mxu1 %v4250_v44  ;;  %v675_v44 = vld [vmem:[%s5405_s27 + $0x578] sm:$0xff]  ;;  %v4060_v47 = vcombine.high %v543_v41, %v547_v42  ;;  %v4059_v53 = vcombine.low %v543_v41, %v547_v42 }
 0x176   : > { %2221 = vmatpush2.bf16.msra.mxu0 %v4121_v49  ;;  %v4188_v48 = vcombine.high %v671_v43, %v675_v44  ;;  %v535_v49 = vld [vmem:[%s5405_s27 + $0x118] sm:$0xff]  ;;  %v4187_v54 = vcombine.low %v671_v43, %v675_v44 }
 0x177   : > { %2222 = vmatprep.subr.bf16.mxu0 %v4114_v51  ;;  %v663_v51 = vld [vmem:[%s5405_s27 + $0x518] sm:$0xff] }
 0x178   : > { %2262 = vmatpush2.bf16.msra.mxu1 %v4249_v50  ;;  %v539_v50 = vld [vmem:[%s5405_s27 + $0x138] sm:$0xff] }
 0x179   : > { %2263 = vmatprep.subr.bf16.mxu1 %v4242_v52  ;;  %v667_v52 = vld [vmem:[%s5405_s27 + $0x538] sm:$0xff]  ;;  %v4052_v55 = vcombine.high %v535_v49, %v539_v50 }
 0x17a   : > { %2223 = vmatpush2.bf16.msra.mxu0 %v4113_v57  ;;  %v4180_v56 = vcombine.high %v663_v51, %v667_v52  ;;  %v527_v57 = vld [vmem:[%s5405_s27 + $0xd8] sm:$0xff] }
 0x17b   : > { %2224 = vmatprep.subr.bf16.mxu0 %v4106_v61  ;;  %v655_v61 = vld [vmem:[%s5405_s27 + $0x4d8] sm:$0xff] }
 0x17c   : > { %2264 = vmatpush2.bf16.msra.mxu1 %v4241_v58  ;;  %v531_v58 = vld [vmem:[%s5405_s27 + $0xf8] sm:$0xff] }
 0x17d   : > { %2265 = vmatprep.subr.bf16.mxu1 %v4234_v62  ;;  %v4051_v62 = vcombine.low %v535_v49, %v539_v50  ;;  %v4044_v63 = vcombine.high %v527_v57, %v531_v58  ;;  %v503_v18 = vld [vmem:[%s5405_s27 + $0x18] sm:$0xff] }
 0x17e   : > { %2225 = vmatpush2.bf16.msra.mxu0 %v4105_v3  ;;  %v647_v3 = vld [vmem:[%s5405_s27 + $0x498] sm:$0xff] }
 0x17f   : > { %2226 = vmatprep.subr.bf16.mxu0 %v4098_v5  ;;  %v4043_v5 = vcombine.low %v527_v57, %v531_v58  ;;  %v507_v19 = vld [vmem:[%s5405_s27 + $0x38] sm:$0xff] }
 0x180   : > { %2266 = vmatpush2.bf16.msra.mxu1 %v4233_v4  ;;  %v651_v4 = vld [vmem:[%s5405_s27 + $0x4b8] sm:$0xff]  ;;  %v4020_v25 = vcombine.high %v503_v18, %v507_v19 }
 0x181   : > { %2267 = vmatprep.subr.bf16.mxu1 %v4226_v6  ;;  %v4164_v8 = vcombine.high %v647_v3, %v651_v4  ;;  %v623_v27 = vld [vmem:[%s5405_s27 + $0x3d8] sm:$0xff] }
 0x182   : > { %2227 = vmatpush2.bf16.msra.mxu0 %v4097_v11  ;;  %v639_v11 = vld [vmem:[%s5405_s27 + $0x458] sm:$0xff] }
 0x183   : > { %2228 = vmatprep.subr.bf16.mxu0 %v4090_v13  ;;  %v4035_v13 = vcombine.low %v519_v1, %v523_v2  ;;  %v627_v28 = vld [vmem:[%s5405_s27 + $0x3f8] sm:$0xff] }
 0x184   : > { %2268 = vmatpush2.bf16.msra.mxu1 %v4225_v12  ;;  %v643_v12 = vld [vmem:[%s5405_s27 + $0x478] sm:$0xff]  ;;  %v4140_v33 = vcombine.high %v623_v27, %v627_v28 }
 0x185   : > { %2269 = vmatprep.subr.bf16.mxu1 %v4218_v14  ;;  %v4163_v14 = vcombine.low %v647_v3, %v651_v4  ;;  %v4156_v16 = vcombine.high %v639_v11, %v643_v12  ;;  %v615_v35 = vld [vmem:[%s5405_s27 + $0x398] sm:$0xff] }
 0x186   : > { %2229 = vmatpush2.bf16.msra.mxu0 %v4089_v21  ;;  %v631_v21 = vld [vmem:[%s5405_s27 + $0x418] sm:$0xff] }
 0x187   : > { %2230 = vmatprep.subr.bf16.mxu0 %v4082_v23  ;;  %v4027_v23 = vcombine.low %v511_v9, %v515_v10  ;;  %v619_v36 = vld [vmem:[%s5405_s27 + $0x3b8] sm:$0xff] }
 0x188   : > { %2270 = vmatpush2.bf16.msra.mxu1 %v4217_v22  ;;  %v635_v22 = vld [vmem:[%s5405_s27 + $0x438] sm:$0xff]  ;;  %v4132_v41 = vcombine.high %v615_v35, %v619_v36 }
 0x189   : > { %2271 = vmatprep.subr.bf16.mxu1 %v4210_v24  ;;  %v4155_v24 = vcombine.low %v639_v11, %v643_v12  ;;  %v4148_v26 = vcombine.high %v631_v21, %v635_v22  ;;  %v607_v43 = vld [vmem:[%s5405_s27 + $0x358] sm:$0xff] }
 0x18a   : > { %2231 = vmatpush2.bf16.msra.mxu0 %v4081_v29  ;;  %v751_v29 = vld [vmem:[%s5405_s27 + $0x7d8] sm:$0xff] }
 0x18b   : > { %2282 = vmatprep.subr.bf16.mxu0 %v4076_v31  ;;  %v4019_v31 = vcombine.low %v503_v18, %v507_v19  ;;  %v611_v44 = vld [vmem:[%s5405_s27 + $0x378] sm:$0xff] }
 0x18c   : > { %2272 = vmatpush2.bf16.msra.mxu1 %v4209_v30  ;;  %v755_v30 = vld [vmem:[%s5405_s27 + $0x7f8] sm:$0xff]  ;;  %v4124_v49 = vcombine.high %v607_v43, %v611_v44 }
 0x18d   : > { %2323 = vmatprep.subr.bf16.mxu1 %v4204_v32  ;;  %2233 = vmatmul.mubr.bf16.vlgmr.msra.gmra.mxu0 %v5509_v17  ;;  %v4147_v32 = vcombine.low %v631_v21, %v635_v22  ;;  %v4268_v34 = vcombine.high %v751_v29, %v755_v30  ;;  %v583_v3 = vld [vmem:[%s5405_s27 + $0x298] sm:$0xff] }
 0x18e   : > { %2283 = vmatpush1.bf16.msra.mxu0 %v4075_v37  ;;  %2314 = vmatprep.mubr.bf16.mxu0 %v5461_v59  ;;  %v659_v59 = vld [vmem:[%s5405_s27 + $0x4f8] sm:$0xff] }
 0x18f   : > { %2274 = vmatmul.mubr.bf16.vlgmr.msra.gmra.mxu1 %v5513_v20  ;;  %2284 = vmatprep.subr.bf16.mxu0 %v4068_v39  ;;  %v4172_v0 = vcombine.high %v655_v61, %v659_v59  ;;  %v4171_v6 = vcombine.low %v655_v61, %v659_v59  ;;  %v743_v37 = vld [vmem:[%s5405_s27 + $0x798] sm:$0xff]  ;;  %v4139_v39 = vcombine.low %v623_v27, %v627_v28 }
 0x190   : > { %2324 = vmatpush1.bf16.msra.mxu1 %v4203_v38  ;;  %2355 = vmatprep.mubr.bf16.mxu1 %v5463_v60  ;;  %v4179_v60 = vcombine.low %v663_v51, %v667_v52  ;;  %v747_v38 = vld [vmem:[%s5405_s27 + $0x7b8] sm:$0xff] }
 0x191   : > { %2325 = vmatprep.subr.bf16.mxu1 %v4196_v40  ;;  %v4267_v40 = vcombine.low %v751_v29, %v755_v30  ;;  %v4260_v42 = vcombine.high %v743_v37, %v747_v38  ;;  %v599_v51 = vld [vmem:[%s5405_s27 + $0x318] sm:$0xff] }
 0x192   : > { %2285 = vmatpush1.bf16.msra.mxu0 %v4067_v45  ;;  %v735_v45 = vld [vmem:[%s5405_s27 + $0x758] sm:$0xff] }
 0x193   : > { %2286 = vmatprep.subr.bf16.mxu0 %v4060_v47  ;;  %v4131_v47 = vcombine.low %v615_v35, %v619_v36  ;;  %v603_v52 = vld [vmem:[%s5405_s27 + $0x338] sm:$0xff]  ;;  %v485_v36 = vld [vmem:[#allocation2] sm:$0xff] }
 0x194   : > { %2326 = vmatpush1.bf16.msra.mxu1 %v4195_v46  ;;  %v739_v46 = vld [vmem:[%s5405_s27 + $0x778] sm:$0xff]  ;;  %v4116_v57 = vcombine.high %v599_v51, %v603_v52 }
 0x195   : > { %2327 = vmatprep.subr.bf16.mxu1 %v4188_v48  ;;  %v4259_v48 = vcombine.low %v743_v37, %v747_v38  ;;  %v4252_v50 = vcombine.high %v735_v45, %v739_v46  ;;  %v591_v61 = vld [vmem:[%s5405_s27 + $0x2d8] sm:$0xff] }
 0x196   : > { %2287 = vmatpush1.bf16.msra.mxu0 %v4059_v53  ;;  %v727_v53 = vld [vmem:[%s5405_s27 + $0x718] sm:$0xff] }
 0x197   : > { %2288 = vmatprep.subr.bf16.mxu0 %v4052_v55  ;;  %v4123_v55 = vcombine.low %v607_v43, %v611_v44  ;;  %v595_v59 = vld [vmem:[%s5405_s27 + $0x2f8] sm:$0xff] }
 0x198   : > { %2328 = vmatpush1.bf16.msra.mxu1 %v4187_v54  ;;  %v731_v54 = vld [vmem:[%s5405_s27 + $0x738] sm:$0xff]  ;;  %v4108_v1 = vcombine.high %v591_v61, %v595_v59 }
 0x199   : > { %2329 = vmatprep.subr.bf16.mxu1 %v4180_v56  ;;  %v4251_v56 = vcombine.low %v735_v45, %v739_v46  ;;  %v4244_v58 = vcombine.high %v727_v53, %v731_v54  ;;  %v587_v4 = vld [vmem:[%s5405_s27 + $0x2b8] sm:$0xff] }
 0x19a   : > { %2289 = vmatpush1.bf16.msra.mxu0 %v4051_v62  ;;  %v719_v62 = vld [vmem:[%s5405_s27 + $0x6d8] sm:$0xff]  ;;  %v4100_v9 = vcombine.high %v583_v3, %v587_v4 }
 0x19b   : > { %2290 = vmatprep.subr.bf16.mxu0 %v4044_v63  ;;  %v4115_v63 = vcombine.low %v599_v51, %v603_v52  ;;  %v575_v11 = vld [vmem:[%s5405_s27 + $0x258] sm:$0xff] }
 0x19c   : > { %2330 = vmatpush1.bf16.msra.mxu1 %v4179_v60  ;;  %v723_v60 = vld [vmem:[%s5405_s27 + $0x6f8] sm:$0xff] }
 0x19d   : > { %2331 = vmatprep.subr.bf16.mxu1 %v4172_v0  ;;  %v4243_v0 = vcombine.low %v727_v53, %v731_v54  ;;  %v4236_v2 = vcombine.high %v719_v62, %v723_v60  ;;  %v579_v12 = vld [vmem:[%s5405_s27 + $0x278] sm:$0xff] }
 0x19e   : > { %2291 = vmatpush1.bf16.msra.mxu0 %v4043_v5  ;;  %v711_v5 = vld [vmem:[%s5405_s27 + $0x698] sm:$0xff]  ;;  %v4092_v18 = vcombine.high %v575_v11, %v579_v12 }
 0x19f   : > { %2292 = vmatprep.subr.bf16.mxu0 %v4036_v7  ;;  %v4107_v7 = vcombine.low %v591_v61, %v595_v59  ;;  %v567_v21 = vld [vmem:[%s5405_s27 + $0x218] sm:$0xff] }
 0x1a0   : > { %2332 = vmatpush1.bf16.msra.mxu1 %v4171_v6  ;;  %v715_v6 = vld [vmem:[%s5405_s27 + $0x6b8] sm:$0xff] }
 0x1a1   : > { %2333 = vmatprep.subr.bf16.mxu1 %v4164_v8  ;;  %v4235_v8 = vcombine.low %v719_v62, %v723_v60  ;;  %v4228_v10 = vcombine.high %v711_v5, %v715_v6  ;;  %v571_v22 = vld [vmem:[%s5405_s27 + $0x238] sm:$0xff]  ;;  %v489_v60 = vld [vmem:[#allocation2 + $0x20] sm:$0xff] }
 0x1a2   : > { %2293 = vmatpush1.bf16.msra.mxu0 %v4035_v13  ;;  %v703_v13 = vld [vmem:[%s5405_s27 + $0x658] sm:$0xff]  ;;  %v4084_v27 = vcombine.high %v567_v21, %v571_v22  ;;  %v4083_v29 = vcombine.low %v567_v21, %v571_v22 }
 0x1a3   : > { %2294 = vmatprep.subr.bf16.mxu0 %v4028_v15  ;;  %v4099_v15 = vcombine.low %v583_v3, %v587_v4  ;;  %v486_v46 = vld [vmem:[#allocation2 + $0x18] sm:$0xff] }
 0x1a4   : > { %2334 = vmatpush1.bf16.msra.mxu1 %v4163_v14  ;;  %v707_v14 = vld [vmem:[%s5405_s27 + $0x678] sm:$0xff] }
 0x1a5   : > { %2335 = vmatprep.subr.bf16.mxu1 %v4156_v16  ;;  %v4227_v16 = vcombine.low %v711_v5, %v715_v6  ;;  %v4220_v19 = vcombine.high %v703_v13, %v707_v14 }
 0x1a6   : > { %2295 = vmatpush1.bf16.msra.mxu0 %v4027_v23  ;;  %v695_v23 = vld [vmem:[%s5405_s27 + $0x618] sm:$0xff] }
 0x1a7   : > { %2296 = vmatprep.subr.bf16.mxu0 %v4020_v25  ;;  %v4091_v25 = vcombine.low %v575_v11, %v579_v12  ;;  %v491_v12 = vld [vmem:[#allocation2 + $0x38] sm:$0xff] }
 0x1a8   : > { %2336 = vmatpush1.bf16.msra.mxu1 %v4155_v24  ;;  %v699_v24 = vld [vmem:[%s5405_s27 + $0x638] sm:$0xff] }
 0x1a9   : > { %2337 = vmatprep.subr.bf16.mxu1 %v4148_v26  ;;  %v4219_v26 = vcombine.low %v703_v13, %v707_v14  ;;  %v4212_v28 = vcombine.high %v695_v23, %v699_v24  ;;  %v4211_v30 = vcombine.low %v695_v23, %v699_v24 }
 0x1aa   : > { %2297 = vmatpush1.bf16.msra.mxu0 %v4019_v31 }
 0x1ab   : > { %2298 = vmatprep.subr.bf16.mxu0 %v4140_v33 }
 0x1ac   : > { %2338 = vmatpush1.bf16.msra.mxu1 %v4147_v32  ;;  %v484_v32 = vld [vmem:[#allocation2 + $0x30] sm:$0xff] }
 0x1ad   : > { %2339 = vmatprep.subr.bf16.mxu1 %v4268_v34 }
 0x1ae   : > { %2299 = vmatpush2.bf16.msra.mxu0 %v4139_v39 }
 0x1af   : > { %2300 = vmatprep.subr.bf16.mxu0 %v4132_v41 }
 0x1b0   : > { %2340 = vmatpush2.bf16.msra.mxu1 %v4267_v40 }
 0x1b1   : > { %2341 = vmatprep.subr.bf16.mxu1 %v4260_v42 }
 0x1b2   : > { %2301 = vmatpush2.bf16.msra.mxu0 %v4131_v47 }
 0x1b3   : > { %2302 = vmatprep.subr.bf16.mxu0 %v4124_v49  ;;  %v487_v49 = vld [vmem:[#allocation2 + $0x10] sm:$0xff] }
 0x1b4   : > { %2342 = vmatpush2.bf16.msra.mxu1 %v4259_v48 }
 0x1b5   : > { %2343 = vmatprep.subr.bf16.mxu1 %v4252_v50 }
 0x1b6   : > { %2303 = vmatpush2.bf16.msra.mxu0 %v4123_v55 }
 0x1b7   : > { %2304 = vmatprep.subr.bf16.mxu0 %v4116_v57 }
 0x1b8   : > { %2344 = vmatpush2.bf16.msra.mxu1 %v4251_v56 }
 0x1b9   : > { %2345 = vmatprep.subr.bf16.mxu1 %v4244_v58  ;;  %v488_v58 = vld [vmem:[#allocation2 + $0x8] sm:$0xff] }
 0x1ba   : > { %2305 = vmatpush2.bf16.msra.mxu0 %v4115_v63 }
 0x1bb   : > { %2306 = vmatprep.subr.bf16.mxu0 %v4108_v1 }
 0x1bc   : > { %2346 = vmatpush2.bf16.msra.mxu1 %v4243_v0 }
 0x1bd   : > { %2347 = vmatprep.subr.bf16.mxu1 %v4236_v2 }
 0x1be   : > { %2307 = vmatpush2.bf16.msra.mxu0 %v4107_v7 }
 0x1bf   : > { %2308 = vmatprep.subr.bf16.mxu0 %v4100_v9 }
 0x1c0   : > { %2348 = vmatpush2.bf16.msra.mxu1 %v4235_v8  ;;  %v490_v8 = vld [vmem:[#allocation2 + $0x28] sm:$0xff] }
 0x1c1   : > { %2349 = vmatprep.subr.bf16.mxu1 %v4228_v10 }
 0x1c2   : > { %2309 = vmatpush2.bf16.msra.mxu0 %v4099_v15 }
 0x1c3   : > { %2310 = vmatprep.subr.bf16.mxu0 %v4092_v18 }
 0x1c4   : > { %2350 = vmatpush2.bf16.msra.mxu1 %v4227_v16 }
 0x1c5   : > { %2351 = vmatprep.subr.bf16.mxu1 %v4220_v19 }
 0x1c6   : > { %2311 = vmatpush2.bf16.msra.mxu0 %v4091_v25 }
 0x1c7   : > { %2312 = vmatprep.subr.bf16.mxu0 %v4084_v27 }
 0x1c8   : > { %2352 = vmatpush2.bf16.msra.mxu1 %v4219_v26 }
 0x1c9   : > { %2353 = vmatprep.subr.bf16.mxu1 %v4212_v28 }
 0x1ca   : > { %2313 = vmatpush2.bf16.msra.mxu0 %v4083_v29 }
 0x1cc   : > { %2354 = vmatpush2.bf16.msra.mxu1 %v4211_v30 }
 0x1cd   : > { %v2070_v31 = vpop.f32.mrf.mxu0  ;;  %2315 = vmatmul.mubr.bf16.vlgmr.msra.gmra.mxu0 %v5509_v17 }
 0x1cf   : > { %v2111_v33 = vpop.f32.mrf.mxu1  ;;  %2356 = vmatmul.mubr.bf16.vlgmr.msra.gmra.mxu1 %v5513_v20  ;;  %v2072_v35 = vpop.f32.mrf.mxu0 }
 0x1d0   : > { %v2112_v34 = vadd.f32 %v2111_v33, %v2070_v31 }
 0x1d1   : > { %v2113_v37 = vpop.f32.mrf.mxu1  ;;  %v2074_v40 = vpop.f32.mrf.mxu0 }
 0x1d2   : > { %v2364_v38 = vadd.f32 %v2112_v34, %v484_v32  ;;  %v2114_v39 = vadd.f32 %v2113_v37, %v2072_v35 }
 0x1d3   : > { %v2115_v41 = vpop.f32.mrf.mxu1  ;;  %v2075_v43 = vpop.f32.mrf.mxu0 }
 0x1d4   : > { %2372 = vst [vmem:[#allocation2 + $0x30] sm:$0xff] %v2364_v38  ;;  %v2365_v42 = vadd.f32 %v2114_v39, %v485_v36 }
 0x1d5   : > { %v2116_v44 = vpop.f32.mrf.mxu1 }
 0x1d6   : > { %2373 = vst [vmem:[#allocation2] sm:$0xff] %v2365_v42 }
 0x20d   : > { %v2152_v45 = vpop.f32.mrf.mxu0 }
 0x20f   : > { %v2193_v17 = vpop.f32.mrf.mxu1  ;;  %v2154_v48 = vpop.f32.mrf.mxu0 }
 0x210   : > { %v2194_v47 = vadd.f32 %v2193_v17, %v2152_v45 }
 0x211   : > { %v2195_v20 = vpop.f32.mrf.mxu1  ;;  %v2156_v52 = vpop.f32.mrf.mxu0 }
 0x212   : > { %v2366_v50 = vadd.f32 %v2194_v47, %v486_v46  ;;  %v2196_v51 = vadd.f32 %v2195_v20, %v2154_v48 }
 0x213   : > { %v2197_v53 = vpop.f32.mrf.mxu1  ;;  %v2157_v55 = vpop.f32.mrf.mxu0 }
 0x214   : > { %2374 = vst [vmem:[#allocation2 + $0x18] sm:$0xff] %v2366_v50  ;;  %v2367_v54 = vadd.f32 %v2196_v51, %v487_v49 }
 0x215   : > { %v2198_v56 = vpop.f32.mrf.mxu1 }
 0x216   : > { %2375 = vst [vmem:[#allocation2 + $0x10] sm:$0xff] %v2367_v54 }
 0x24d   : > { %v2234_v57 = vpop.f32.mrf.mxu0 }
 0x24f   : > { %v2275_v61 = vpop.f32.mrf.mxu1  ;;  %v2236_v62 = vpop.f32.mrf.mxu0 }
 0x250   : > { %v2276_v59 = vadd.f32 %v2275_v61, %v2234_v57 }
 0x251   : > { %v2277_v63 = vpop.f32.mrf.mxu1  ;;  %v2238_v2 = vpop.f32.mrf.mxu0 }
 0x252   : > { %v2368_v0 = vadd.f32 %v2276_v59, %v488_v58  ;;  %v2278_v1 = vadd.f32 %v2277_v63, %v2236_v62 }
 0x253   : > { %v2279_v3 = vpop.f32.mrf.mxu1  ;;  %v2239_v5 = vpop.f32.mrf.mxu0 }
 0x254   : > { %2376 = vst [vmem:[#allocation2 + $0x8] sm:$0xff] %v2368_v0  ;;  %v2369_v4 = vadd.f32 %v2278_v1, %v489_v60 }
 0x255   : > { %v2280_v6 = vpop.f32.mrf.mxu1 }
 0x256   : > { %2377 = vst [vmem:[#allocation2 + $0x20] sm:$0xff] %v2369_v4 }
 0x28d   : > { %v2316_v7 = vpop.f32.mrf.mxu0 }
 0x28f   : > { %v2357_v9 = vpop.f32.mrf.mxu1  ;;  %v2318_v11 = vpop.f32.mrf.mxu0 }
 0x290   : > { %v2358_v10 = vadd.f32 %v2357_v9, %v2316_v7 }
 0x291   : > { %v2359_v13 = vpop.f32.mrf.mxu1  ;;  %v2320_v16 = vpop.f32.mrf.mxu0 }
 0x292   : > { %v2370_v14 = vadd.f32 %v2358_v10, %v490_v8  ;;  %v2360_v15 = vadd.f32 %v2359_v13, %v2318_v11  ;;  %2383 = sbr.rel (%p4269_p8) target bundleno = 1274 (0x4fa), region = 100 }
 0x293   : > { %v2361_v18 = vpop.f32.mrf.mxu1  ;;  %v2321_v21 = vpop.f32.mrf.mxu0 }
 0x294   : > { %2378 = vst [vmem:[#allocation2 + $0x28] sm:$0xff] %v2370_v14  ;;  %v2371_v19 = vadd.f32 %v2360_v15, %v491_v12 }
 0x295   : > { %v2362_v22 = vpop.f32.mrf.mxu1 }
 0x296   : > { %2379 = vst [vmem:[#allocation2 + $0x38] sm:$0xff] %v2371_v19 }
 0x297   : > { %v4573_v23 = vld [vmem:[#allocation11 + $0x74] ss:$8 sps:$4 sm:$0xff]   ;;  %v4577_v25 = vld [vmem:[#allocation11 + $0x70] ss:$8 sps:$4 sm:$0xff]   ;;  %v4579_v27 = vld [vmem:[#allocation11 + $0x64] ss:$8 sps:$4 sm:$0xff]   ;;  %v2548_v63 = vlaneseq }
 0x298   : > { %v4575_v24 = vld [vmem:[#allocation11 + $0x174] ss:$8 sps:$4 sm:$0xff]   ;;  %3429 = vmatprep.subr.bf16.mxu0 %v4573_v23  ;;  %v4578_v26 = vld [vmem:[#allocation11 + $0x170] ss:$8 sps:$4 sm:$0xff]   ;;  %v4581_v28 = vld [vmem:[#allocation11 + $0x164] ss:$8 sps:$4 sm:$0xff]  }
 0x299   : > { %3470 = vmatprep.subr.bf16.mxu1 %v4575_v24  ;;  %3430 = vmatpush1.bf16.msra.mxu0 %v4577_v25  ;;  %v4583_v29 = vld [vmem:[#allocation11 + $0x60] ss:$8 sps:$4 sm:$0xff]   ;;  %v4585_v31 = vld [vmem:[#allocation11 + $0x54] ss:$8 sps:$4 sm:$0xff]   ;;  %v4589_v33 = vld [vmem:[#allocation11 + $0x50] ss:$8 sps:$4 sm:$0xff]  }
 0x29a   : > { %3471 = vmatpush1.bf16.msra.mxu1 %v4578_v26  ;;  %3431 = vmatprep.subr.bf16.mxu0 %v4579_v27  ;;  %v4584_v30 = vld [vmem:[#allocation11 + $0x160] ss:$8 sps:$4 sm:$0xff]   ;;  %v4587_v32 = vld [vmem:[#allocation11 + $0x154] ss:$8 sps:$4 sm:$0xff]   ;;  %v4590_v34 = vld [vmem:[#allocation11 + $0x150] ss:$8 sps:$4 sm:$0xff]  }
 0x29b   : > { %3472 = vmatprep.subr.bf16.mxu1 %v4581_v28  ;;  %v4591_v35 = vld [vmem:[#allocation11 + $0x44] ss:$8 sps:$4 sm:$0xff]   ;;  %v4595_v37 = vld [vmem:[#allocation11 + $0x40] ss:$8 sps:$4 sm:$0xff]   ;;  %v4597_v39 = vld [vmem:[#allocation11 + $0x34] ss:$8 sps:$4 sm:$0xff]  }
 0x29c   : > { %v4593_v36 = vld [vmem:[#allocation11 + $0x144] ss:$8 sps:$4 sm:$0xff]   ;;  %v4596_v38 = vld [vmem:[#allocation11 + $0x140] ss:$8 sps:$4 sm:$0xff]   ;;  %v4599_v40 = vld [vmem:[#allocation11 + $0x134] ss:$8 sps:$4 sm:$0xff]  }
 0x29d   : > { %3432 = vmatpush1.bf16.msra.mxu0 %v4583_v29  ;;  %v4601_v41 = vld [vmem:[#allocation11 + $0x30] ss:$8 sps:$4 sm:$0xff]   ;;  %v4603_v43 = vld [vmem:[#allocation11 + $0x24] ss:$8 sps:$4 sm:$0xff]   ;;  %v4607_v45 = vld [vmem:[#allocation11 + $0x20] ss:$8 sps:$4 sm:$0xff]  }
 0x29e   : > { %3473 = vmatpush1.bf16.msra.mxu1 %v4584_v30  ;;  %3433 = vmatprep.subr.bf16.mxu0 %v4585_v31  ;;  %v4602_v42 = vld [vmem:[#allocation11 + $0x130] ss:$8 sps:$4 sm:$0xff]   ;;  %v4605_v44 = vld [vmem:[#allocation11 + $0x124] ss:$8 sps:$4 sm:$0xff]   ;;  %v4608_v46 = vld [vmem:[#allocation11 + $0x120] ss:$8 sps:$4 sm:$0xff]  }
 0x29f   : > { %3474 = vmatprep.subr.bf16.mxu1 %v4587_v32  ;;  %v4609_v17 = vld [vmem:[#allocation11 + $0x14] ss:$8 sps:$4 sm:$0xff]   ;;  %v4613_v48 = vld [vmem:[#allocation11 + $0x10] ss:$8 sps:$4 sm:$0xff]   ;;  %v4615_v20 = vld [vmem:[#allocation11 + $0x4] ss:$8 sps:$4 sm:$0xff]  }
 0x2a0   : > { %v4611_v47 = vld [vmem:[#allocation11 + $0x114] ss:$8 sps:$4 sm:$0xff]   ;;  %v4614_v49 = vld [vmem:[#allocation11 + $0x110] ss:$8 sps:$4 sm:$0xff]   ;;  %v4617_v50 = vld [vmem:[#allocation11 + $0x104] ss:$8 sps:$4 sm:$0xff]  }
 0x2a1   : > { %3434 = vmatpush1.bf16.msra.mxu0 %v4589_v33  ;;  %v4619_v51 = vld [vmem:[#allocation11] ss:$8 sps:$4 sm:$0xff]   ;;  %v4621_v53 = vld [vmem:[#allocation11 + $0xf4] ss:$8 sps:$4 sm:$0xff]   ;;  %v4625_v55 = vld [vmem:[#allocation11 + $0xf0] ss:$8 sps:$4 sm:$0xff]  }
 0x2a2   : > { %3475 = vmatpush1.bf16.msra.mxu1 %v4590_v34  ;;  %3435 = vmatprep.subr.bf16.mxu0 %v4591_v35  ;;  %v4620_v52 = vld [vmem:[#allocation11 + $0x100] ss:$8 sps:$4 sm:$0xff]   ;;  %v4623_v54 = vld [vmem:[#allocation11 + $0x1f4] ss:$8 sps:$4 sm:$0xff]   ;;  %v4626_v56 = vld [vmem:[#allocation11 + $0x1f0] ss:$8 sps:$4 sm:$0xff]  }
 0x2a3   : > { %3476 = vmatprep.subr.bf16.mxu1 %v4593_v36  ;;  %v4627_v57 = vld [vmem:[#allocation11 + $0xe4] ss:$8 sps:$4 sm:$0xff]   ;;  %v4631_v61 = vld [vmem:[#allocation11 + $0xe0] ss:$8 sps:$4 sm:$0xff]   ;;  %v4633_v62 = vld [vmem:[#allocation11 + $0xd4] ss:$8 sps:$4 sm:$0xff]  }
 0x2a4   : > { %v4629_v58 = vld [vmem:[#allocation11 + $0x1e4] ss:$8 sps:$4 sm:$0xff]   ;;  %v4632_v59 = vld [vmem:[#allocation11 + $0x1e0] ss:$8 sps:$4 sm:$0xff]   ;;  %v4635_v60 = vld [vmem:[#allocation11 + $0x1d4] ss:$8 sps:$4 sm:$0xff]  }
 0x2a5   : > { %3436 = vmatpush1.bf16.msra.mxu0 %v4595_v37  ;;  %v4637_v0 = vld [vmem:[#allocation11 + $0xd0] ss:$8 sps:$4 sm:$0xff]   ;;  %v4639_v2 = vld [vmem:[#allocation11 + $0xc4] ss:$8 sps:$4 sm:$0xff]   ;;  %v5716_v5 = vshrl.u32 %v2548_v63, 7 }
 0x2a6   : > { %3477 = vmatpush1.bf16.msra.mxu1 %v4596_v38  ;;  %3437 = vmatprep.subr.bf16.mxu0 %v4597_v39  ;;  %v4638_v1 = vld [vmem:[#allocation11 + $0x1d0] ss:$8 sps:$4 sm:$0xff]   ;;  %v4641_v3 = vld [vmem:[#allocation11 + $0x1c4] ss:$8 sps:$4 sm:$0xff]   ;;  %v4643_v6 = vld [vmem:[#allocation11 + $0xc0] ss:$8 sps:$4 sm:$0xff]  }
 0x2a7   : > { %3478 = vmatprep.subr.bf16.mxu1 %v4599_v40  ;;  %v5714_v4 = vld [vmem:[#allocation2] sm:$0xff]  ;;  %v4644_v7 = vld [vmem:[#allocation11 + $0x1c0] ss:$8 sps:$4 sm:$0xff]   ;;  %v2566_v13 = vsub.s32 4, %v5716_v5  ;;  %v2574_v23 = vsub.s32 6, %v5716_v5  ;;  %v5736_v32 = vld [vmem:[#allocation9] sm:$0xff] }
 0x2a8   : > { %v2400_v8 = vrot.slane %v5714_v4, 4  ;;  %v5719_v9 = vld [vmem:[#allocation2 + $0x10] sm:$0xff]  ;;  %v5724_v12 = vld [vmem:[#allocation2 + $0x18] sm:$0xff]  ;;  %v4645_v14 = vld [vmem:[#allocation11 + $0xb4] ss:$8 sps:$4 sm:$0xff]  }
 0x2a9   : > { %3438 = vmatpush1.bf16.msra.mxu0 %v4601_v41  ;;  %v2412_v10 = vrot.slane %v5719_v9, 4  ;;  %v5722_v11 = vld [vmem:[#allocation2 + $0x30] sm:$0xff]  ;;  %v4647_v15 = vld [vmem:[#allocation11 + $0x1b4] ss:$8 sps:$4 sm:$0xff]   ;;  %v4649_v19 = vld [vmem:[#allocation11 + $0xb0] ss:$8 sps:$4 sm:$0xff]   ;;  %v5742_v38 = vrot.slane %v5736_v32, %v2566_v13 }
 0x2aa   : > { %3479 = vmatpush1.bf16.msra.mxu1 %v4602_v42  ;;  %3439 = vmatprep.subr.bf16.mxu0 %v4603_v43  ;;  %v2401_v16 = vadd.f32 %v2400_v8, %v5714_v4  ;;  %v2394_v18 = vrot.slane %v5722_v11, 4  ;;  %v2406_v22 = vrot.slane %v5724_v12, 4  ;;  %v4650_v24 = vld [vmem:[#allocation11 + $0x1b0] ss:$8 sps:$4 sm:$0xff]   ;;  %v4651_v27 = vld [vmem:[#allocation11 + $0xa4] ss:$8 sps:$4 sm:$0xff]   ;;  %v5748_v42 = vrot.slane %v5736_v32, %v2574_v23 }
 0x2ab   : > { %3480 = vmatprep.subr.bf16.mxu1 %v4605_v44  ;;  %v2413_v21 = vadd.f32 %v2412_v10, %v5719_v9  ;;  %v5733_v28 = vld [vmem:[#allocation8] sm:$0xff]  ;;  %v4653_v31 = vld [vmem:[#allocation11 + $0x1a4] ss:$8 sps:$4 sm:$0xff]   ;;  %v4655_v43 = vld [vmem:[#allocation11 + $0xa0] ss:$8 sps:$4 sm:$0xff]  }
 0x2ac   : > { %v2402_v25 = vrot.slane %v2401_v16, 2  ;;  %v2395_v26 = vadd.f32 %v2394_v18, %v5722_v11  ;;  %v2407_v30 = vadd.f32 %v2406_v22, %v5724_v12  ;;  %v5739_v35 = vrot.slane %v5733_v28, %v2566_v13  ;;  %v4656_v44 = vld [vmem:[#allocation11 + $0x1a0] ss:$8 sps:$4 sm:$0xff]   ;;  %v4671_v8 = vld [vmem:[#allocation11 + $0x274] ss:$8 sps:$4 sm:$0xff]  }
 0x2ad   : > { %3440 = vmatpush1.bf16.msra.mxu0 %v4607_v45  ;;  %v2414_v29 = vrot.slane %v2413_v21, 2  ;;  %v5745_v39 = vrot.slane %v5733_v28, %v2574_v23 }
 0x2ae   : > { %3481 = vmatpush1.bf16.msra.mxu1 %v4608_v46  ;;  %3441 = vmatprep.subr.bf16.mxu0 %v4609_v17  ;;  %v2403_v33 = vadd.f32 %v2402_v25, %v2401_v16  ;;  %v2396_v34 = vrot.slane %v2395_v26, 2  ;;  %v2408_v37 = vrot.slane %v2407_v30, 2  ;;  %v4657_v17 = vld [vmem:[#allocation11 + $0x94] ss:$8 sps:$4 sm:$0xff]  }
 0x2af   : > { %3482 = vmatprep.subr.bf16.mxu1 %v4611_v47  ;;  %v2415_v36 = vadd.f32 %v2414_v29, %v2413_v21  ;;  %v4659_v47 = vld [vmem:[#allocation11 + $0x194] ss:$8 sps:$4 sm:$0xff]  }
 0x2b0   : > { %v2404_v40 = vrot.slane %v2403_v33, 1  ;;  %v2397_v41 = vadd.f32 %v2396_v34, %v2395_v26  ;;  %v2409_v46 = vadd.f32 %v2408_v37, %v2407_v30 }
 0x2b1   : > { %3442 = vmatpush1.bf16.msra.mxu0 %v4613_v48  ;;  %v2416_v45 = vrot.slane %v2415_v36, 1 }
 0x2b2   : > { %3483 = vmatpush1.bf16.msra.mxu1 %v4614_v49  ;;  %3443 = vmatprep.subr.bf16.mxu0 %v4615_v20  ;;  %v2405_v48 = vadd.f32 %v2404_v40, %v2403_v33  ;;  %v2398_v49 = vrot.slane %v2397_v41, 1 }
 0x2b3   : > { %3484 = vmatprep.subr.bf16.mxu1 %v4617_v50  ;;  %v2417_v20 = vadd.f32 %v2416_v45, %v2415_v36  ;;  %v2410_v50 = vrot.slane %v2409_v46, 1 }
 0x2b5   : > { %3444 = vmatpush1.bf16.msra.mxu0 %v4619_v51  ;;  %v2444_v51 = vmul.f32 0.125, %v2405_v48 }
 0x2b6   : > { %3485 = vmatpush1.bf16.msra.mxu1 %v4620_v52  ;;  %3445 = vmatprep.subr.bf16.mxu0 %v4621_v53  ;;  %v2399_v52 = vadd.f32 %v2398_v49, %v2397_v41  ;;  %v4661_v53 = vld [vmem:[#allocation11 + $0x90] ss:$8 sps:$4 sm:$0xff]   ;;  %v5771_v49 = vsub.s32 1, %v5716_v5 }
 0x2b7   : > { %3486 = vmatprep.subr.bf16.mxu1 %v4623_v54  ;;  %v4662_v54 = vld [vmem:[#allocation11 + $0x190] ss:$8 sps:$4 sm:$0xff]  }
 0x2b9   : > { %3446 = vmatpush2.bf16.msra.mxu0 %v4625_v55  ;;  %v2446_v55 = vmul.f32 0.125, %v2417_v20  ;;  %v2562_v20 = vsub.s32 3, %v5716_v5 }
 0x2ba   : > { %3487 = vmatpush2.bf16.msra.mxu1 %v4626_v56  ;;  %3447 = vmatprep.subr.bf16.mxu0 %v4627_v57  ;;  %v2411_v56 = vadd.f32 %v2410_v50, %v2409_v46  ;;  %v4663_v57 = vld [vmem:[#allocation11 + $0x84] ss:$8 sps:$4 sm:$0xff]   ;;  %v5775_v50 = vsub.s32 0, %v5716_v5 }
 0x2bb   : > { %3488 = vmatprep.subr.bf16.mxu1 %v4629_v58  ;;  %v4665_v58 = vld [vmem:[#allocation11 + $0x184] ss:$8 sps:$4 sm:$0xff]  }
 0x2bd   : > { %3448 = vmatpush2.bf16.msra.mxu0 %v4631_v61  ;;  %v5751_v61 = vsub.f32 %v5714_v4, %v2444_v51  ;;  %v2558_v51 = vsub.s32 2, %v5716_v5 }
 0x2be   : > { %3489 = vmatpush2.bf16.msra.mxu1 %v4632_v59  ;;  %3449 = vmatprep.subr.bf16.mxu0 %v4633_v62  ;;  %v2443_v59 = vmul.f32 0.125, %v2399_v52  ;;  %v5754_v62 = vsub.f32 %v5719_v9, %v2446_v55  ;;  %v4674_v9 = vld [vmem:[#allocation11 + $0x374] ss:$8 sps:$4 sm:$0xff]   ;;  %v2555_v52 = vrot.slane %v5733_v28, %v5771_v49  ;;  %v5784_v55 = vld [vmem:[#allocation2 + $0x38] sm:$0xff] }
 0x2bf   : > { %3490 = vmatprep.subr.bf16.mxu1 %v4635_v60  ;;  %v2445_v60 = vmul.f32 0.125, %v2411_v56  ;;  %v2460_v63 = vmul.f32 %v5751_v61, %v5751_v61  ;;  %v2563_v56 = vrot.slane %v5733_v28, %v2562_v20 }
 0x2c1   : > { %3450 = vmatpush2.bf16.msra.mxu0 %v4637_v0  ;;  %v5759_v0 = vsub.f32 %v5722_v11, %v2443_v59  ;;  %v5764_v4 = vsub.f32 %v5724_v12, %v2445_v60  ;;  %v2436_v59 = vrot.slane %v5784_v55, 4  ;;  %v5790_v60 = vld [vmem:[#allocation2 + $0x8] sm:$0xff] }
 0x2c2   : > { %3491 = vmatpush2.bf16.msra.mxu1 %v4638_v1  ;;  %3451 = vmatprep.subr.bf16.mxu0 %v4639_v2  ;;  %v4667_v1 = vld [vmem:[#allocation11 + $0x80] ss:$8 sps:$4 sm:$0xff]  }
 0x2c3   : > { %3492 = vmatprep.subr.bf16.mxu1 %v4641_v3  ;;  %v4668_v2 = vld [vmem:[#allocation11 + $0x180] ss:$8 sps:$4 sm:$0xff]   ;;  %v2462_v3 = vmul.f32 %v5754_v62, %v5754_v62  ;;  %v2461_v11 = vmul.f32 %v5764_v4, %v5764_v4 }
 0x2c5   : > { %3452 = vmatpush2.bf16.msra.mxu0 %v4643_v6  ;;  %v2473_v6 = vrot.slane %v2460_v63, 4  ;;  %v2485_v10 = vrot.slane %v2462_v3, 4  ;;  %v2479_v16 = vrot.slane %v2461_v11, 4 }
 0x2c6   : > { %3493 = vmatpush2.bf16.msra.mxu1 %v4644_v7  ;;  %3453 = vmatprep.subr.bf16.mxu0 %v4645_v14  ;;  %v2459_v7 = vmul.f32 %v5759_v0, %v5759_v0 }
 0x2c7   : > { %3494 = vmatprep.subr.bf16.mxu1 %v4647_v15  ;;  %v2474_v13 = vadd.f32 %v2473_v6, %v2460_v63  ;;  %v2486_v15 = vadd.f32 %v2485_v10, %v2462_v3  ;;  %v2480_v21 = vadd.f32 %v2479_v16, %v2461_v11  ;;  %v5792_v63 = vld [vmem:[#allocation2 + $0x28] sm:$0xff]  ;;  %v2600_v3 = vrot.slane %v5736_v32, %v5775_v50 }
 0x2c8   : > { %v2467_v14 = vrot.slane %v2459_v7, 4  ;;  %v2418_v6 = vrot.slane %v5790_v60, 4  ;;  %v2559_v10 = vrot.slane %v5733_v28, %v2558_v51  ;;  %v2608_v16 = vrot.slane %v5736_v32, %v2558_v51  ;;  %v4677_v51 = vld [vmem:[#allocation11 + $0x264] ss:$8 sps:$4 sm:$0xff]  }
 0x2c9   : > { %3454 = vmatpush2.bf16.msra.mxu0 %v4649_v19  ;;  %v2475_v12 = vrot.slane %v2474_v13, 2  ;;  %v2487_v19 = vrot.slane %v2486_v15, 2  ;;  %v2481_v25 = vrot.slane %v2480_v21, 2 }
 0x2ca   : > { %3495 = vmatpush2.bf16.msra.mxu1 %v4650_v24  ;;  %3455 = vmatprep.subr.bf16.mxu0 %v4651_v27  ;;  %v2468_v18 = vadd.f32 %v2467_v14, %v2459_v7  ;;  %v2430_v7 = vrot.slane %v5792_v63, 4 }
 0x2cb   : > { %3496 = vmatprep.subr.bf16.mxu1 %v4653_v31  ;;  %v2476_v22 = vadd.f32 %v2475_v12, %v2474_v13  ;;  %v2488_v24 = vadd.f32 %v2487_v19, %v2486_v15  ;;  %v2482_v30 = vadd.f32 %v2481_v25, %v2480_v21  ;;  %v2437_v13 = vadd.f32 %v2436_v59, %v5784_v55 }
 0x2cc   : > { %v2469_v23 = vrot.slane %v2468_v18, 2  ;;  %v2419_v12 = vadd.f32 %v2418_v6, %v5790_v60 }
 0x2cd   : > { %3456 = vmatpush2.bf16.msra.mxu0 %v4655_v43  ;;  %v2477_v26 = vrot.slane %v2476_v22, 1  ;;  %v2489_v29 = vrot.slane %v2488_v24, 1  ;;  %v2483_v36 = vrot.slane %v2482_v30, 1 }
 0x2ce   : > { %3497 = vmatpush2.bf16.msra.mxu1 %v4656_v44  ;;  %3457 = vmatprep.subr.bf16.mxu0 %v4657_v17  ;;  %v2470_v27 = vadd.f32 %v2469_v23, %v2468_v18  ;;  %v2431_v18 = vadd.f32 %v2430_v7, %v5792_v63  ;;  %v2438_v23 = vrot.slane %v2437_v13, 2 }
 0x2cf   : > { %3498 = vmatprep.subr.bf16.mxu1 %v4659_v47  ;;  %v2478_v31 = vadd.f32 %v2477_v26, %v2476_v22  ;;  %v2490_v34 = vadd.f32 %v2489_v29, %v2488_v24  ;;  %v2484_v43 = vadd.f32 %v2483_v36, %v2482_v30  ;;  %v2420_v26 = vrot.slane %v2419_v12, 2 }
 0x2d0   : > { %v2471_v33 = vrot.slane %v2470_v27, 1 }
 0x2d1   : > { %3458 = vmatpush2.bf16.msra.mxu0 %v4661_v53  ;;  %v2516_v37 = vmul.f32 0.125, %v2478_v31  ;;  %v2518_v41 = vmul.f32 0.125, %v2490_v34  ;;  %v2517_v17 = vmul.f32 0.125, %v2484_v43  ;;  %v2604_v53 = vrot.slane %v5736_v32, %v5771_v49 }
 0x2d2   : > { %3499 = vmatpush2.bf16.msra.mxu1 %v4662_v54  ;;  %3459 = vmatprep.subr.bf16.mxu0 %v4663_v57  ;;  %v2472_v40 = vadd.f32 %v2471_v33, %v2470_v27  ;;  %v5782_v54 = vld [vmem:[#allocation2 + $0x20] sm:$0xff]  ;;  %v2612_v57 = vrot.slane %v5736_v32, %v2562_v20  ;;  %v2432_v27 = vrot.slane %v2431_v18, 2  ;;  %v2439_v31 = vadd.f32 %v2438_v23, %v2437_v13  ;;  %v4675_v13 = vld [vmem:[#allocation11 + $0x260] ss:$8 sps:$4 sm:$0xff]  }
 0x2d3   : > { %3500 = vmatprep.subr.bf16.mxu1 %v4665_v58  ;;  %v2524_v44 = vadd.f32 0.001, %v2516_v37  ;;  %v2526_v46 = vadd.f32 0.001, %v2518_v41  ;;  %v2525_v48 = vadd.f32 0.001, %v2517_v17  ;;  %v2421_v36 = vadd.f32 %v2420_v26, %v2419_v12 }
 0x2d4   : > { %v2515_v45 = vmul.f32 0.125, %v2472_v40  ;;  %v2424_v58 = vrot.slane %v5782_v54, 4  ;;  %v2433_v37 = vadd.f32 %v2432_v27, %v2431_v18  ;;  %v4672_v20 = vld [vmem:[#allocation11 + $0x370] ss:$8 sps:$4 sm:$0xff]   ;;  %v4683_v12 = vld [vmem:[#allocation11 + $0x254] ss:$8 sps:$4 sm:$0xff]  }
 0x2d5   : > { %3460 = vmatpush2.bf16.msra.mxu0 %v4667_v1  ;;  %4781 = vrsqrt.f32 %v2524_v44  ;;  %v2440_v44 = vrot.slane %v2439_v31, 1  ;;  %v2422_v17 = vrot.slane %v2421_v36, 1  ;;  %v4686_v18 = vld [vmem:[#allocation11 + $0x354] ss:$8 sps:$4 sm:$0xff]  }
 0x2d6   : > { %3501 = vmatpush2.bf16.msra.mxu1 %v4668_v2  ;;  %3511 = vmatprep.subr.bf16.mxu0 %v4671_v8  ;;  %v2523_v47 = vadd.f32 0.001, %v2515_v45  ;;  %4783 = vrsqrt.f32 %v2526_v46  ;;  %v2551_v2 = vrot.slane %v5733_v28, %v5775_v50  ;;  %v2425_v11 = vadd.f32 %v2424_v58, %v5782_v54  ;;  %v4669_v46 = vld [vmem:[#allocation11 + $0x270] ss:$8 sps:$4 sm:$0xff]   ;;  %v4680_v58 = vld [vmem:[#allocation11 + $0x364] ss:$8 sps:$4 sm:$0xff]  }
 0x2d7   : > { %3552 = vmatprep.subr.bf16.mxu1 %v4674_v9  ;;  %v2423_v59 = vadd.f32 %v2422_v17, %v2421_v36 }
 0x2d8   : > { %4785 = vrsqrt.f32 %v2523_v47  ;;  %v2434_v47 = vrot.slane %v2433_v37, 1 }
 0x2d9   : > { %4787 = vrsqrt.f32 %v2525_v48 }
 0x2e2   : > { %v4782_v1 = vpop.eup %4781 }
 0x2e3   : > { %v4784_v8 = vpop.eup %4783  ;;  %v2540_v9 = vmul.f32 %v4782_v1, %v5751_v61  ;;  %v2426_v61 = vrot.slane %v2425_v11, 2  ;;  %v2435_v1 = vadd.f32 %v2434_v47, %v2433_v37 }
 0x2e4   : > { %v2542_v15 = vmul.f32 %v4784_v8, %v5754_v62  ;;  %v2447_v8 = vmul.f32 0.125, %v2423_v59 }
 0x2e5   : > { %v4786_v14 = vpop.eup %4785  ;;  %v2589_v21 = vmul.f32 %v2555_v52, %v2540_v9  ;;  %v2427_v62 = vadd.f32 %v2426_v61, %v2425_v11  ;;  %v2449_v9 = vmul.f32 0.125, %v2435_v1 }
 0x2e6   : > { %v4788_v19 = vpop.eup %4787  ;;  %v2539_v22 = vmul.f32 %v4786_v14, %v5759_v0  ;;  %v2591_v24 = vmul.f32 %v2563_v56, %v2542_v15  ;;  %v5817_v14 = vsub.f32 %v5790_v60, %v2447_v8 }
 0x2e7   : > { %v2541_v25 = vmul.f32 %v4788_v19, %v5764_v4  ;;  %v2638_v29 = vadd.f32 %v2604_v53, %v2589_v21  ;;  %v2428_v43 = vrot.slane %v2427_v62, 1  ;;  %v2441_v53 = vadd.f32 %v2440_v44, %v2439_v31 }
 0x2e8   : > { %v2588_v30 = vmul.f32 %v2551_v2, %v2539_v22  ;;  %v2640_v33 = vadd.f32 %v2612_v57, %v2591_v24  ;;  %v5820_v15 = vsub.f32 %v5792_v63, %v2449_v9  ;;  %v2463_v19 = vmul.f32 %v5817_v14, %v5817_v14  ;;  %v4681_v22 = vld [vmem:[#allocation11 + $0x250] ss:$8 sps:$4 sm:$0xff]   ;;  %v4707_v9 = vld [vmem:[#allocation11 + $0x214] ss:$8 sps:$4 sm:$0xff]  }
 0x2e9   : > { %v2590_v34 = vmul.f32 %v2559_v10, %v2541_v25  ;;  %v2646_v40 = vmax.f32 %v2638_v29, 0.0  ;;  %v2429_v52 = vadd.f32 %v2428_v43, %v2427_v62  ;;  %v2450_v6 = vmul.f32 0.125, %v2441_v53  ;;  %v4684_v24 = vld [vmem:[#allocation11 + $0x350] ss:$8 sps:$4 sm:$0xff]   ;;  %v4689_v25 = vld [vmem:[#allocation11 + $0x244] ss:$8 sps:$4 sm:$0xff]  }
 0x2ea   : > { %v2637_v41 = vadd.f32 %v2600_v3, %v2588_v30  ;;  %v2648_v0 = vmax.f32 %v2640_v33, 0.0  ;;  %v2465_v60 = vmul.f32 %v5820_v15, %v5820_v15  ;;  %v2491_v61 = vrot.slane %v2463_v19, 4  ;;  %v4692_v29 = vld [vmem:[#allocation11 + $0x344] ss:$8 sps:$4 sm:$0xff]  }
 0x2eb   : > { %v2639_v45 = vadd.f32 %v2608_v16, %v2590_v34  ;;  %v2654_v4 = vpack.c.bf16 %v2646_v40, %v2646_v40  ;;  %v2448_v3 = vmul.f32 0.125, %v2429_v52  ;;  %v5814_v11 = vsub.f32 %v5784_v55, %v2450_v6  ;;  %v4678_v16 = vld [vmem:[#allocation11 + $0x360] ss:$8 sps:$4 sm:$0xff]   ;;  %v4701_v52 = vld [vmem:[#allocation11 + $0x224] ss:$8 sps:$4 sm:$0xff]  }
 0x2ec   : > { %v2645_v48 = vmax.f32 %v2637_v41, 0.0  ;;  %v2656_v56 = vpack.c.bf16 %v2648_v0, %v2648_v0  ;;  %v2503_v23 = vrot.slane %v2465_v60, 4  ;;  %v2492_v30 = vadd.f32 %v2491_v61, %v2463_v19  ;;  %v4687_v34 = vld [vmem:[#allocation11 + $0x240] ss:$8 sps:$4 sm:$0xff]   ;;  %v4695_v41 = vld [vmem:[#allocation11 + $0x234] ss:$8 sps:$4 sm:$0xff]  }
 0x2ed   : > { %v2647_v57 = vmax.f32 %v2639_v45, 0.0  ;;  %3461 = vmatprep.mubr.bf16.mxu0 %v2654_v4  ;;  %v5811_v10 = vsub.f32 %v5782_v54, %v2448_v3  ;;  %v2466_v55 = vmul.f32 %v5814_v11, %v5814_v11  ;;  %v4690_v40 = vld [vmem:[#allocation11 + $0x340] ss:$8 sps:$4 sm:$0xff]   ;;  %v4698_v0 = vld [vmem:[#allocation11 + $0x334] ss:$8 sps:$4 sm:$0xff]  }
 0x2ee   : > { %v2653_v2 = vpack.c.bf16 %v2645_v48, %v2645_v48  ;;  %3502 = vmatprep.mubr.bf16.mxu1 %v2656_v56  ;;  %v2504_v62 = vadd.f32 %v2503_v23, %v2465_v60  ;;  %v2493_v36 = vrot.slane %v2492_v30, 2  ;;  %v4693_v4 = vld [vmem:[#allocation11 + $0x230] ss:$8 sps:$4 sm:$0xff]   ;;  %v4699_v3 = vld [vmem:[#allocation11 + $0x220] ss:$8 sps:$4 sm:$0xff]  }
 0x2ef   : > { %v2655_v7 = vpack.c.bf16 %v2647_v57, %v2647_v57  ;;  %v2464_v54 = vmul.f32 %v5811_v10, %v5811_v10  ;;  %v2509_v21 = vrot.slane %v2466_v55, 4  ;;  %v4704_v57 = vld [vmem:[#allocation11 + $0x324] ss:$8 sps:$4 sm:$0xff]   ;;  %v4702_v6 = vld [vmem:[#allocation11 + $0x320] ss:$8 sps:$4 sm:$0xff]  }
 0x2f0   : > { %3462 = vmatmul.mubr.bf16.vlgmr.msra.gmra.mxu0 %v2653_v2  ;;  %v2505_v37 = vrot.slane %v2504_v62, 2  ;;  %v2494_v45 = vadd.f32 %v2493_v36, %v2492_v30  ;;  %v4708_v19 = vld [vmem:[#allocation11 + $0x310] ss:$8 sps:$4 sm:$0xff]   ;;  %v4713_v60 = vld [vmem:[#allocation11 + $0x204] ss:$8 sps:$4 sm:$0xff]  }
 0x2f1   : > { %3503 = vmatmul.mubr.bf16.vlgmr.msra.gmra.mxu1 %v2655_v7  ;;  %3512 = vmatpush1.bf16.msra.mxu0 %v4669_v46  ;;  %v2497_v63 = vrot.slane %v2464_v54, 4  ;;  %v2510_v27 = vadd.f32 %v2509_v21, %v2466_v55  ;;  %v4711_v21 = vld [vmem:[#allocation11 + $0x200] ss:$8 sps:$4 sm:$0xff]   ;;  %v4719_v61 = vld [vmem:[#allocation11 + $0x2f4] ss:$8 sps:$4 sm:$0xff]  }
 0x2f2   : > { %3553 = vmatpush1.bf16.msra.mxu1 %v4672_v20  ;;  %3513 = vmatprep.subr.bf16.mxu0 %v4677_v51  ;;  %v2506_v46 = vadd.f32 %v2505_v37, %v2504_v62  ;;  %v2495_v48 = vrot.slane %v2494_v45, 1  ;;  %v4696_v51 = vld [vmem:[#allocation11 + $0x330] ss:$8 sps:$4 sm:$0xff]   ;;  %v4722_v23 = vld [vmem:[#allocation11 + $0x3f4] ss:$8 sps:$4 sm:$0xff]  }
 0x2f3   : > { %3554 = vmatprep.subr.bf16.mxu1 %v4680_v58  ;;  %v2498_v26 = vadd.f32 %v2497_v63, %v2464_v54  ;;  %v2511_v33 = vrot.slane %v2510_v27, 2  ;;  %v4716_v63 = vld [vmem:[#allocation11 + $0x304] ss:$8 sps:$4 sm:$0xff]   ;;  %v4726_v37 = vld [vmem:[#allocation11 + $0x3e0] ss:$8 sps:$4 sm:$0xff]  }
 0x2f4   : > { %v2507_v20 = vrot.slane %v2506_v46, 1  ;;  %v2496_v58 = vadd.f32 %v2495_v48, %v2494_v45  ;;  %v4728_v30 = vld [vmem:[#allocation11 + $0x3e4] ss:$8 sps:$4 sm:$0xff]  }
 0x2f5   : > { %3514 = vmatpush1.bf16.msra.mxu0 %v4675_v13  ;;  %v2499_v31 = vrot.slane %v2498_v26, 2  ;;  %v2512_v44 = vadd.f32 %v2511_v33, %v2510_v27  ;;  %v4720_v27 = vld [vmem:[#allocation11 + $0x3f0] ss:$8 sps:$4 sm:$0xff]   ;;  %v4723_v33 = vld [vmem:[#allocation11 + $0x2e0] ss:$8 sps:$4 sm:$0xff]  }
 0x2f6   : > { %3555 = vmatpush1.bf16.msra.mxu1 %v4678_v16  ;;  %3515 = vmatprep.subr.bf16.mxu0 %v4683_v12  ;;  %v2508_v59 = vadd.f32 %v2507_v20, %v2506_v46  ;;  %v2519_v7 = vmul.f32 0.125, %v2496_v58  ;;  %v4710_v12 = vld [vmem:[#allocation11 + $0x314] ss:$8 sps:$4 sm:$0xff]   ;;  %v4737_v20 = vld [vmem:[#allocation11 + $0x2c4] ss:$8 sps:$4 sm:$0xff]  }
 0x2f7   : > { %3556 = vmatprep.subr.bf16.mxu1 %v4686_v18  ;;  %v2500_v43 = vadd.f32 %v2499_v31, %v2498_v26  ;;  %v2513_v47 = vrot.slane %v2512_v44, 1  ;;  %v4705_v18 = vld [vmem:[#allocation11 + $0x210] ss:$8 sps:$4 sm:$0xff]   ;;  %v2578_v26 = vsub.s32 7, %v5716_v5 }
 0x2f8   : > { %v2521_v8 = vmul.f32 0.125, %v2508_v59  ;;  %v2527_v54 = vadd.f32 0.001, %v2519_v7  ;;  %v4738_v59 = vld [vmem:[#allocation11 + $0x3c0] ss:$8 sps:$4 sm:$0xff]  }
 0x2f9   : > { %3516 = vmatpush1.bf16.msra.mxu0 %v4681_v22  ;;  %v2501_v17 = vrot.slane %v2500_v43, 1  ;;  %v2514_v56 = vadd.f32 %v2513_v47, %v2512_v44  ;;  %v4714_v22 = vld [vmem:[#allocation11 + $0x300] ss:$8 sps:$4 sm:$0xff]   ;;  %v4734_v44 = vld [vmem:[#allocation11 + $0x3d4] ss:$8 sps:$4 sm:$0xff]   ;;  %v2628_v45 = vrot.slane %v5736_v32, %v2578_v26 }
 0x2fa   : > { %3557 = vmatpush1.bf16.msra.mxu1 %v4684_v24  ;;  %3517 = vmatprep.subr.bf16.mxu0 %v4689_v25  ;;  %v2529_v55 = vadd.f32 0.001, %v2521_v8  ;;  %v2570_v24 = vsub.s32 5, %v5716_v5  ;;  %v4717_v25 = vld [vmem:[#allocation11 + $0x2f0] ss:$8 sps:$4 sm:$0xff]  }
 0x2fb   : > { %3558 = vmatprep.subr.bf16.mxu1 %v4692_v29  ;;  %v2502_v53 = vadd.f32 %v2501_v17, %v2500_v43  ;;  %v2522_v2 = vmul.f32 0.125, %v2514_v56  ;;  %v4725_v29 = vld [vmem:[#allocation11 + $0x2e4] ss:$8 sps:$4 sm:$0xff]   ;;  %v4729_v47 = vld [vmem:[#allocation11 + $0x2d0] ss:$8 sps:$4 sm:$0xff]  }
 0x2fc   : > { %v2571_v62 = vrot.slane %v5733_v28, %v2570_v24  ;;  %v4752_v7 = vld [vmem:[#allocation11 + $0x3a4] ss:$8 sps:$4 sm:$0xff]   ;;  %v4750_v8 = vld [vmem:[#allocation11 + $0x3a0] ss:$8 sps:$4 sm:$0xff]  }
 0x2fd   : > { %3518 = vmatpush1.bf16.msra.mxu0 %v4687_v34  ;;  %v2520_v1 = vmul.f32 0.125, %v2502_v53  ;;  %v2530_v16 = vadd.f32 0.001, %v2522_v2  ;;  %v2579_v34 = vrot.slane %v5733_v28, %v2578_v26  ;;  %v4769_v26 = vld [vmem:[#allocation15 + $0x68] sm:$0xff]  }
 0x2fe   : > { %3559 = vmatpush1.bf16.msra.mxu1 %v4690_v40  ;;  %3519 = vmatprep.subr.bf16.mxu0 %v4695_v41  ;;  %v4731_v40 = vld [vmem:[#allocation11 + $0x2d4] ss:$8 sps:$4 sm:$0xff]   ;;  %v2620_v41 = vrot.slane %v5736_v32, %v2570_v24 }
 0x2ff   : > { %3560 = vmatprep.subr.bf16.mxu1 %v4698_v0  ;;  %v2528_v13 = vadd.f32 0.001, %v2520_v1  ;;  %v4743_v1 = vld [vmem:[#allocation11 + $0x2b4] ss:$8 sps:$4 sm:$0xff]  }
 0x300   : > { %v4767_v24 = vld [vmem:[#allocation15 + $0x70] sm:$0xff]  }
 0x301   : > { %3520 = vmatpush1.bf16.msra.mxu0 %v4693_v4  ;;  %4789 = vrsqrt.f32 %v2528_v13  ;;  %v4758_v13 = vld [vmem:[#allocation11 + $0x394] ss:$8 sps:$4 sm:$0xff]  }
 0x302   : > { %3561 = vmatpush1.bf16.msra.mxu1 %v4696_v51  ;;  %3521 = vmatprep.subr.bf16.mxu0 %v4701_v52  ;;  %4791 = vrsqrt.f32 %v2530_v16  ;;  %v4753_v16 = vld [vmem:[#allocation11 + $0x290] ss:$8 sps:$4 sm:$0xff]  }
 0x303   : > { %3562 = vmatprep.subr.bf16.mxu1 %v4704_v57  ;;  %4793 = vrsqrt.f32 %v2527_v54  ;;  %v4735_v57 = vld [vmem:[#allocation11 + $0x2c0] ss:$8 sps:$4 sm:$0xff]   ;;  %v4761_v54 = vld [vmem:[#allocation11 + $0x284] ss:$8 sps:$4 sm:$0xff]  }
 0x304   : > { %4795 = vrsqrt.f32 %v2529_v55  ;;  %v4764_v55 = vld [vmem:[#allocation11 + $0x384] ss:$8 sps:$4 sm:$0xff]  }
 0x305   : > { %3522 = vmatpush1.bf16.msra.mxu0 %v4699_v3 }
 0x306   : > { %3563 = vmatpush1.bf16.msra.mxu1 %v4702_v6  ;;  %3523 = vmatprep.subr.bf16.mxu0 %v4707_v9  ;;  %v4741_v6 = vld [vmem:[#allocation11 + $0x2b0] ss:$8 sps:$4 sm:$0xff]   ;;  %v4755_v9 = vld [vmem:[#allocation11 + $0x294] ss:$8 sps:$4 sm:$0xff]  }
 0x307   : > { %3564 = vmatprep.subr.bf16.mxu1 %v4710_v12  ;;  %v4756_v12 = vld [vmem:[#allocation11 + $0x390] ss:$8 sps:$4 sm:$0xff]  }
 0x309   : > { %3524 = vmatpush1.bf16.msra.mxu0 %v4705_v18 }
 0x30a   : > { %3565 = vmatpush1.bf16.msra.mxu1 %v4708_v19  ;;  %3525 = vmatprep.subr.bf16.mxu0 %v4713_v60  ;;  %v4759_v19 = vld [vmem:[#allocation11 + $0x280] ss:$8 sps:$4 sm:$0xff]  }
 0x30b   : > { %3566 = vmatprep.subr.bf16.mxu1 %v4716_v63  ;;  %v4762_v63 = vld [vmem:[#allocation11 + $0x380] ss:$8 sps:$4 sm:$0xff]  }
 0x30d   : > { %3526 = vmatpush1.bf16.msra.mxu0 %v4711_v21 }
 0x30e   : > { %3567 = vmatpush1.bf16.msra.mxu1 %v4714_v22  ;;  %3527 = vmatprep.subr.bf16.mxu0 %v4719_v61  ;;  %v4790_v31 = vpop.eup %4789  ;;  %v4765_v61 = vld [vmem:[#allocation15 + $0x78] sm:$0xff]  }
 0x30f   : > { %3568 = vmatprep.subr.bf16.mxu1 %v4722_v23  ;;  %v4792_v36 = vpop.eup %4791  ;;  %v2544_v5 = vmul.f32 %v4790_v31, %v5811_v10  ;;  %v4732_v10 = vld [vmem:[#allocation11 + $0x3d0] ss:$8 sps:$4 sm:$0xff]   ;;  %v4766_v23 = vld [vmem:[#allocation15 + $0x38] sm:$0xff]  }
 0x310   : > { %v4794_v43 = vpop.eup %4793  ;;  %v2546_v0 = vmul.f32 %v4792_v36, %v5814_v11  ;;  %v4740_v11 = vld [vmem:[#allocation11 + $0x3c4] ss:$8 sps:$4 sm:$0xff]   ;;  %v4774_v31 = vld [vmem:[#allocation15 + $0x18] sm:$0xff]  }
 0x311   : > { %3528 = vmatpush2.bf16.msra.mxu0 %v4717_v25  ;;  %v4796_v46 = vpop.eup %4795  ;;  %v2593_v17 = vmul.f32 %v2571_v62, %v2544_v5  ;;  %v2543_v28 = vmul.f32 %v4794_v43, %v5817_v14  ;;  %v4768_v25 = vld [vmem:[#allocation15 + $0x30] sm:$0xff]   ;;  %v4773_v62 = vld [vmem:[#allocation15 + $0x58] sm:$0xff]   ;;  %v4777_v36 = vld [vmem:[#allocation15 + $0x48] sm:$0xff]  }
 0x312   : > { %3569 = vmatpush2.bf16.msra.mxu1 %v4720_v27  ;;  %3529 = vmatprep.subr.bf16.mxu0 %v4725_v29  ;;  %v2595_v4 = vmul.f32 %v2579_v34, %v2546_v0  ;;  %v2545_v48 = vmul.f32 %v4796_v46, %v5820_v15  ;;  %v4770_v27 = vld [vmem:[#allocation15 + $0x28] sm:$0xff]   ;;  %v4771_v29 = vld [vmem:[#allocation15 + $0x60] sm:$0xff]   ;;  %v4776_v34 = vld [vmem:[#allocation15 + $0x10] sm:$0xff]  }
 0x313   : > { %3570 = vmatprep.subr.bf16.mxu1 %v4728_v30  ;;  %v2642_v51 = vadd.f32 %v2620_v41, %v2593_v17  ;;  %v2592_v52 = vmul.f32 %v5739_v35, %v2543_v28  ;;  %v4746_v35 = vld [vmem:[#allocation11 + $0x3b4] ss:$8 sps:$4 sm:$0xff]   ;;  %v4772_v30 = vld [vmem:[#allocation15 + $0x20] sm:$0xff]  }
 0x314   : > { %v2644_v53 = vadd.f32 %v2628_v45, %v2595_v4  ;;  %v2594_v32 = vmul.f32 %v5745_v39, %v2545_v48  ;;  %v4749_v39 = vld [vmem:[#allocation11 + $0x2a4] ss:$8 sps:$4 sm:$0xff]  }
 0x315   : > { %3530 = vmatpush2.bf16.msra.mxu0 %v4723_v33  ;;  %v2650_v56 = vmax.f32 %v2642_v51, 0.0  ;;  %v2641_v14 = vadd.f32 %v5742_v38, %v2592_v52  ;;  %v4744_v38 = vld [vmem:[#allocation11 + $0x3b0] ss:$8 sps:$4 sm:$0xff]   ;;  %v4780_v5 = vld [vmem:[#allocation15] sm:$0xff]  }
 0x316   : > { %3571 = vmatpush2.bf16.msra.mxu1 %v4726_v37  ;;  %3531 = vmatprep.subr.bf16.mxu0 %v4731_v40  ;;  %v2652_v58 = vmax.f32 %v2644_v53, 0.0  ;;  %v2643_v15 = vadd.f32 %v5748_v42, %v2594_v32  ;;  %v4747_v42 = vld [vmem:[#allocation11 + $0x2a0] ss:$8 sps:$4 sm:$0xff]   ;;  %v4775_v33 = vld [vmem:[#allocation15 + $0x50] sm:$0xff]   ;;  %v4778_v37 = vld [vmem:[#allocation15 + $0x8] sm:$0xff]  }
 0x317   : > { %3572 = vmatprep.subr.bf16.mxu1 %v4734_v44  ;;  %v2658_v2 = vpack.c.bf16 %v2650_v56, %v2650_v56  ;;  %v2649_v18 = vmax.f32 %v2641_v14, 0.0  ;;  %v4779_v40 = vld [vmem:[#allocation15 + $0x40] sm:$0xff]  }
 0x318   : > { %v2660_v3 = vpack.c.bf16 %v2652_v58, %v2652_v58  ;;  %v2651_v60 = vmax.f32 %v2643_v15, 0.0 }
 0x319   : > { %3532 = vmatpush2.bf16.msra.mxu0 %v4729_v47  ;;  %3543 = vmatprep.mubr.bf16.mxu0 %v2658_v2  ;;  %v2657_v21 = vpack.c.bf16 %v2649_v18, %v2649_v18 }
 0x31a   : > { %3573 = vmatpush2.bf16.msra.mxu1 %v4732_v10  ;;  %3533 = vmatprep.subr.bf16.mxu0 %v4737_v20  ;;  %v2659_v22 = vpack.c.bf16 %v2651_v60, %v2651_v60 }
 0x31b   : > { %3574 = vmatprep.subr.bf16.mxu1 %v4740_v11  ;;  %3584 = vmatprep.mubr.bf16.mxu1 %v2660_v3 }
 0x31d   : > { %3534 = vmatpush2.bf16.msra.mxu0 %v4735_v57 }
 0x31e   : > { %3575 = vmatpush2.bf16.msra.mxu1 %v4738_v59  ;;  %3535 = vmatprep.subr.bf16.mxu0 %v4743_v1 }
 0x31f   : > { %3576 = vmatprep.subr.bf16.mxu1 %v4746_v35 }
 0x321   : > { %3536 = vmatpush2.bf16.msra.mxu0 %v4741_v6 }
 0x322   : > { %3577 = vmatpush2.bf16.msra.mxu1 %v4744_v38  ;;  %3537 = vmatprep.subr.bf16.mxu0 %v4749_v39 }
 0x323   : > { %3578 = vmatprep.subr.bf16.mxu1 %v4752_v7 }
 0x325   : > { %3538 = vmatpush2.bf16.msra.mxu0 %v4747_v42 }
 0x326   : > { %3579 = vmatpush2.bf16.msra.mxu1 %v4750_v8  ;;  %3539 = vmatprep.subr.bf16.mxu0 %v4755_v9 }
 0x327   : > { %3580 = vmatprep.subr.bf16.mxu1 %v4758_v13 }
 0x329   : > { %3540 = vmatpush2.bf16.msra.mxu0 %v4753_v16 }
 0x32a   : > { %3581 = vmatpush2.bf16.msra.mxu1 %v4756_v12  ;;  %3541 = vmatprep.subr.bf16.mxu0 %v4761_v54 }
 0x32b   : > { %3582 = vmatprep.subr.bf16.mxu1 %v4764_v55 }
 0x32d   : > { %3542 = vmatpush2.bf16.msra.mxu0 %v4759_v19 }
 0x32e   : > { %3583 = vmatpush2.bf16.msra.mxu1 %v4762_v63  ;;  %4422 = vmatprep.subr.bf16.mxu0 %v4765_v61 }
 0x330   : > { %3544 = vmatmul.mubr.bf16.vlgmr.msra.gmra.mxu0 %v2657_v21 }
 0x331   : > { %3585 = vmatmul.mubr.bf16.vlgmr.msra.gmra.mxu1 %v2659_v22  ;;  %4423 = vmatpush3.bf16.msra.mxu0 %v4766_v23 }
 0x332   : > { %4424 = vmatprep.subr.bf16.mxu0 %v4767_v24 }
 0x335   : > { %4425 = vmatpush3.bf16.msra.mxu0 %v4768_v25 }
 0x336   : > { %4426 = vmatprep.subr.bf16.mxu0 %v4769_v26 }
 0x339   : > { %4427 = vmatpush3.bf16.msra.mxu0 %v4770_v27 }
 0x33a   : > { %4428 = vmatprep.subr.bf16.mxu0 %v4771_v29 }
 0x33d   : > { %4429 = vmatpush3.bf16.msra.mxu0 %v4772_v30 }
 0x33e   : > { %4430 = vmatprep.subr.bf16.mxu0 %v4773_v62 }
 0x341   : > { %4431 = vmatpush3.bf16.msra.mxu0 %v4774_v31 }
 0x342   : > { %4432 = vmatprep.subr.bf16.mxu0 %v4775_v33  ;;  %v3593_v33 = vld [vmem:[#allocation12] sm:$0x3] }
 0x345   : > { %4433 = vmatpush3.bf16.msra.mxu0 %v4776_v34  ;;  %v3594_v34 = vld [vmem:[#allocation14] sm:$0x3] }
 0x346   : > { %4434 = vmatprep.subr.bf16.mxu0 %v4777_v36  ;;  %v3637_v36 = vrot.slane %v3593_v33, %v5775_v50 }
 0x349   : > { %4435 = vmatpush3.bf16.msra.mxu0 %v4778_v37 }
 0x34a   : > { %4436 = vmatprep.subr.bf16.mxu0 %v4779_v40 }
 0x34d   : > { %4437 = vmatpush3.bf16.msra.mxu0 %v4780_v5  ;;  %v3641_v5 = vrot.slane %v3593_v33, %v5771_v49 }
 0x3b0   : > { %v3463_v41 = vpop.f32.mrf.mxu0 }
 0x3b1   : > { %v3504_v43 = vpop.f32.mrf.mxu1 }
 0x3b2   : > { %v3505_v44 = vadd.f32 %v3504_v43, %v3463_v41  ;;  %v3465_v0 = vpop.f32.mrf.mxu0  ;;  %v3650_v41 = vrot.slane %v3594_v34, %v5775_v50 }
 0x3b3   : > { %v3506_v45 = vpop.f32.mrf.mxu1 }
 0x3b4   : > { %v3467_v46 = vpop.f32.mrf.mxu0  ;;  %v3507_v48 = vadd.f32 %v3506_v45, %v3465_v0  ;;  %v3654_v45 = vrot.slane %v3594_v34, %v5771_v49 }
 0x3b5   : > { %v3508_v17 = vpop.f32.mrf.mxu1 }
 0x3b6   : > { %v3468_v28 = vpop.f32.mrf.mxu0 }
 0x3b7   : > { %v3509_v47 = vpop.f32.mrf.mxu1 }
 0x3f0   : > { %v3545_v4 = vpop.f32.mrf.mxu0 }
 0x3f1   : > { %v3546_v10 = vadd.f32 %v3545_v4, %v3505_v44  ;;  %v3586_v20 = vpop.f32.mrf.mxu1 }
 0x3f2   : > { %v3547_v51 = vpop.f32.mrf.mxu0 }
 0x3f3   : > { %v3587_v52 = vadd.f32 %v3586_v20, %v3546_v10  ;;  %v3548_v11 = vadd.f32 %v3547_v51, %v3507_v48  ;;  %v3588_v53 = vpop.f32.mrf.mxu1  ;;  %v4398_v51 = vld [vmem:[#allocation17] ss:$0 sm:$0xff] }
 0x3f4   : > { %v3549_v32 = vpop.f32.mrf.mxu0 }
 0x3f5   : > { %v3595_v56 = vrot.slane %v3587_v52, 4  ;;  %v3589_v14 = vadd.f32 %v3588_v53, %v3548_v11  ;;  %v3590_v57 = vpop.f32.mrf.mxu1 }
 0x3f6   : > { %v3550_v58 = vpop.f32.mrf.mxu0 }
 0x3f7   : > { %v3596_v15 = vadd.f32 %v3595_v56, %v3587_v52  ;;  %v3601_v59 = vrot.slane %v3589_v14, 4  ;;  %v3591_v1 = vpop.f32.mrf.mxu1 }
 0x3f9   : > { %v3597_v2 = vrot.slane %v3596_v15, 2  ;;  %v3602_v35 = vadd.f32 %v3601_v59, %v3589_v14 }
 0x3fb   : > { %v3598_v3 = vadd.f32 %v3597_v2, %v3596_v15  ;;  %v3603_v6 = vrot.slane %v3602_v35, 2 }
 0x3fd   : > { %v3599_v38 = vrot.slane %v3598_v3, 1  ;;  %v3604_v39 = vadd.f32 %v3603_v6, %v3602_v35 }
 0x3ff   : > { %v3600_v7 = vadd.f32 %v3599_v38, %v3598_v3  ;;  %v3605_v42 = vrot.slane %v3604_v39, 1 }
 0x401   : > { %v3607_v8 = vmul.f32 0.125, %v3600_v7  ;;  %v3606_v9 = vadd.f32 %v3605_v42, %v3604_v39 }
 0x403   : > { %v3609_v13 = vsub.f32 %v3587_v52, %v3607_v8  ;;  %v3608_v16 = vmul.f32 0.125, %v3606_v9 }
 0x405   : > { %v3611_v12 = vmul.f32 %v3609_v13, %v3609_v13  ;;  %v3610_v54 = vsub.f32 %v3589_v14, %v3608_v16 }
 0x407   : > { %v3613_v55 = vrot.slane %v3611_v12, 4  ;;  %v3612_v18 = vmul.f32 %v3610_v54, %v3610_v54 }
 0x409   : > { %v3614_v19 = vadd.f32 %v3613_v55, %v3611_v12  ;;  %v3619_v60 = vrot.slane %v3612_v18, 4 }
 0x40b   : > { %v3615_v63 = vrot.slane %v3614_v19, 2  ;;  %v3620_v21 = vadd.f32 %v3619_v60, %v3612_v18 }
 0x40d   : > { %v3616_v22 = vadd.f32 %v3615_v63, %v3614_v19  ;;  %v3621_v61 = vrot.slane %v3620_v21, 2 }
 0x40f   : > { %v3617_v23 = vrot.slane %v3616_v22, 1  ;;  %v3622_v24 = vadd.f32 %v3621_v61, %v3620_v21 }
 0x411   : > { %v3618_v25 = vadd.f32 %v3617_v23, %v3616_v22  ;;  %v3623_v26 = vrot.slane %v3622_v24, 1 }
 0x413   : > { %v3625_v27 = vmul.f32 0.125, %v3618_v25  ;;  %v3624_v29 = vadd.f32 %v3623_v26, %v3622_v24 }
 0x415   : > { %v3627_v30 = vadd.f32 0.001, %v3625_v27  ;;  %v3626_v62 = vmul.f32 0.125, %v3624_v29 }
 0x417   : > { %4797 = vrsqrt.f32 %v3627_v30  ;;  %v3628_v31 = vadd.f32 0.001, %v3626_v62 }
 0x419   : > { %4799 = vrsqrt.f32 %v3628_v31 }
 0x424   : > { %v4798_v37 = vpop.eup %4797 }
 0x425   : > { %v3631_v40 = vmul.f32 %v4798_v37, %v3609_v13 }
 0x426   : > { %v4800_v43 = vpop.eup %4799 }
 0x427   : > { %v3644_v44 = vmul.f32 %v3637_v36, %v3631_v40  ;;  %v3632_v0 = vmul.f32 %v4800_v43, %v3610_v54 }
 0x429   : > { %v3645_v46 = vmul.f32 %v3641_v5, %v3632_v0  ;;  %v3657_v17 = vadd.f32 %v3650_v41, %v3644_v44 }
 0x42b   : > { %v3658_v28 = vadd.f32 %v3654_v45, %v3645_v46  ;;  %v3659_v47 = vmax.f32 %v3657_v17, 0.0 }
 0x42d   : > { %v3660_v4 = vmax.f32 %v3658_v28, 0.0  ;;  %v3661_v10 = vpack.c.bf16 %v3659_v47, %v3659_v47 }
 0x42f   : > { %v3662_v48 = vpack.c.bf16 %v3660_v4, %v3660_v4 }
 0x431   : > { %3830 = vmatprep.mubr.bf16.mxu0 %v3662_v48 }
 0x432   : > { %3831 = vmatmul.mubr.bf16.vlgmr.msra.gmra.mxu0 %v3661_v10 }
 0x4f2   : > { %v4438_v20 = vpop.f32.mrf.mxu0 }
 0x4f4   : > { %v4439_v52 = vpop.f32.mrf.mxu0 }
 0x4f5   : > { %v4440_v11 = vadd.f32 %v4439_v52, %v4438_v20 }
 0x4f6   : > { %v4441_v53 = vpop.f32.mrf.mxu0 }
 0x4f7   : > { %v3833_v50 = vadd.f32 %v4440_v11, %v4398_v51 }
 0x4f8   : > { %v4442_v32 = vpop.f32.mrf.mxu0 }
 0x4f9   : > { %3838 = vst [vmem:[#allocation18] sm:$0xff] %v3833_v50 }
 0x4fa PF: > { %p4524_p5 = scmp.eq.s32.totalorder %s5211_s15, 3  ;;  %s5139_s16 = smov [#allocation18]  }
 0x4fb   : > { %s3846_s19 = sshll.u32 %s5139_s16, 4  ;;  %s3847_s19 = int_to_ptr.vmem [resolvable:$true] %s3846_s19 }
 0x4fc   : > { %s5039_s14 = scalar_lea.vmem %s3847_s19, 128  ;;  %p5046_p6 = scmp.lt.s32.totalorder %s3847_s19, %s3847_s19 }
 0x4fd   : > { %p5040_p7 = scmp.ne.s32.totalorder %s3847_s19, %s5039_s14  ;;  %p5047_p9 = scmp.lt.s32.totalorder %s5039_s14, %s5039_s14 }
 0x4ff   : > { %p5041_p10 = pnand %p5040_p7, %p4524_p5  ;;  %p5048_p11 = por %p5047_p9, %p5046_p6 }
 0x501   : > { %p5042_p0 = pneg %p5041_p10 }
 0x503   : > { %p5049_p12 = pnand %p5048_p11, %p5042_p0 }
 0x505   : > { %5052 = shalt.err (!%p5049_p12)
}
 0x506   : > { %4477 = dma.vmem_to_hbm [thread:$0]  (%p4524_p5), %s3847_s19, 128, %s5882_s9, [#allocation5]  }
 0x507   : > { %5104 = dma.done.wait (%p4524_p5), [#allocation5], 128  }
 0x508   : > { %5106 = vsyncadd (%p4524_p5), [#allocation5], 4294967168 }
 0x509 PF: > { %p26_p13 = scmp.ge.s32.totalorder %s5295_s24, 6   ;;  %s5907_s30 = smov %s5113_s10 }
 0x50a   : > { %s5908_s10 = smov %s5117_s11  ;;  %s5909_s11 = smov %s5306_s23 }
 0x50b   : > { %s5910_s12 = smov %s5295_s24  ;;  %28 = sbr.rel (!%p26_p13) target bundleno = 12 (0xc), region = 142 }
 0x510   :  { %3859 = vsyncpa [#allocation4], 1 }
 0x511   :  { %3861 = vsyncpa [#allocation4 + $0x1], 1 }
 0x512   :  { %3862 = vsyncpa [#allocation7], 1 }
 0x513   :  { %3864 = vsyncpa [#allocation7 + $0x1], 1 }
 0x514   :  { %3865 = vsyncpa [#allocation10], 1 }
 0x515   :  { %3866 = vsyncpa [#allocation13], 1 }
 0x516   :  { %3867 = vsyncpa [#allocation16], 1 }
 0x517   :  { %3868 = vsyncpa [#allocation5], 1 }
 0x518   :  { %3870 = vsyncpa [#allocation5 + $0x1], 1 }

</bundles_post_ra>
